<compile_context>
chip_gen: v7x
topology: tpu7x:2x2x1
jax: 0.10.0
libtpu: 0.0.40
codegen_flags: <defaults>
</compile_context>

<pallas_src>
import jax
import jax.numpy as jnp
from jax import lax
from jax.experimental import pallas as pl
from jax.experimental.pallas import tpu as pltpu


def lpkt_step_kernel(proj23_ref, proj4_ref, proj5_ref, qt_ref, qtp1_ref,
                     h0_ref, w23ht_ref, w4h_ref, w4lg_ref, w5h_ref,
                     o_ref, h_ref, ht_ref):
    t = pl.program_id(1)
    tb, n_skill, d_k = h_ref.shape

    q_t = qt_ref[0]                                            # (tb, n_skill)

    @pl.when(t == 0)
    def _init():
        h0 = h0_ref[...]                                       # (n_skill, d_k)
        h_ref[...] = jnp.broadcast_to(h0[None, :, :], (tb, n_skill, d_k))
        # h_tilde_pre = q_e @ h_pre (h_pre identical across batch)
        ht_ref[...] = jnp.dot(q_t, h0, preferred_element_type=jnp.float32)

    h_tilde_pre = ht_ref[...]                                  # (tb, d_k)

    # linear_2 / linear_3 pre-activations: state-independent parts were
    # precomputed; the h_tilde-dependent parts use one stacked (d_k -> 2d_k)
    # matmul and are split with static slices.
    pg = proj23_ref[0] + jnp.dot(h_tilde_pre, w23ht_ref[...],
                                 preferred_element_type=jnp.float32)
    pre = pg[:, :d_k]
    gam = pg[:, d_k:]
    # LG = sigmoid(gam) * (tanh(pre)+1)/2  ==  sigmoid(gam) * sigmoid(2*pre)
    LG = jax.nn.sigmoid(gam) * jax.nn.sigmoid(2.0 * pre)       # (tb, d_k)

    h = h_ref[...]                                             # (tb, n_skill, d_k)
    # linear_4: gf = h @ w4_h^T + LG @ w4_lg^T + (it @ w4_it^T + b4)
    gf = lax.dot_general(h, w4h_ref[...],
                         dimension_numbers=(((2,), (0,)), ((), ())),
                         preferred_element_type=jnp.float32)
    row = jnp.dot(LG, w4lg_ref[...],
                  preferred_element_type=jnp.float32) + proj4_ref[0]
    gamma_f = jax.nn.sigmoid(gf + row[:, None, :])
    # TODO(synk): chunk this (tb, n_skill, d_k) gate math over n_skill for very
    # large n_skill to bound VMEM / vreg pressure (v7x 64 MiB per TC).
    h_new = q_t[:, :, None] * LG[:, None, :] + gamma_f * h     # + dropout(LG~)=eval id
    h_ref[...] = h_new

    q_tp1 = qtp1_ref[0]                                        # (tb, n_skill)
    h_tilde = jnp.sum(q_tp1[:, :, None] * h_new, axis=1)       # (tb, d_k)
    ht_ref[...] = h_tilde

    # linear_5 + sigmoid + mean  -> prediction for step t+1
    y_lin = proj5_ref[0] + jnp.dot(h_tilde, w5h_ref[...],
                                   preferred_element_type=jnp.float32)
    y = jnp.sum(jax.nn.sigmoid(y_lin), axis=1) * (1.0 / d_k)   # (tb,)
    o_ref[pl.ds(t, 1), :] = y[None, :]


def lpkt_forward(params, e_data, at_data, a_data, it_data, q_matrix, h0, d_a,
                 batch_tile=None):
    B, L = e_data.shape
    n_skill, d_k = h0.shape
    w2, w3, w4, w5 = params['w2'], params['w3'], params['w4'], params['w5']
    d_e = w5.shape[1] - d_k           # forward semantics require d_e == d_k

    tb = B if batch_tile is None else batch_tile
    assert B % tb == 0 and (tb == B or tb % 8 == 0)
    nb = B // tb
    steps = L - 1

    # ---- sequence-level precompute (plain JAX, one big matmul each) --------
    e_emb = params['e_embed'][e_data]                # (B, L, d_k)
    at_emb = params['at_embed'][at_data]
    it_emb = params['it_embed'][it_data]
    a_rep = jnp.broadcast_to(a_data[..., None].astype(jnp.float32), (B, L, d_a))
    x1 = jnp.concatenate([e_emb, at_emb, a_rep], axis=2)
    learning = jnp.einsum('bli,oi->blo', x1, params['w1']) + params['b1']

    learning_s = learning[:, :steps]                 # learning at steps 0..L-2
    learning_pre_s = jnp.concatenate(
        [jnp.zeros((B, 1, d_k), jnp.float32), learning[:, :steps - 1]], axis=1)
    it_s = it_emb[:, :steps]

    # static parts of linear_2 and linear_3 (stacked along the output dim)
    cat3 = jnp.concatenate([learning_pre_s, it_s, learning_s], axis=2)
    w23_static = jnp.concatenate([w2[:, :3 * d_k], w3[:, :3 * d_k]], axis=0)
    b23 = jnp.concatenate([params['b2'], params['b3']])
    proj23 = jnp.einsum('bli,oi->blo', cat3, w23_static) + b23     # (B,L-1,2dk)
    proj4 = jnp.einsum('bli,oi->blo', it_s, w4[:, 2 * d_k:]) + params['b4']
    proj5 = jnp.einsum('bli,oi->blo', e_emb[:, 1:], w5[:, :d_e]) + params['b5']

    q_seq = q_matrix[e_data]                         # (B, L, n_skill)

    # time-major layouts so each grid step reads one (1, tb, feat) slab
    proj23_t = jnp.transpose(proj23, (1, 0, 2))      # (L-1, B, 2dk)
    proj4_t = jnp.transpose(proj4, (1, 0, 2))        # (L-1, B, dk)
    proj5_t = jnp.transpose(proj5, (1, 0, 2))        # (L-1, B, dk)
    q_tm = jnp.transpose(q_seq, (1, 0, 2))           # (L,   B, n_skill)

    # pre-transposed (in, out) weights used inside the recurrence
    w23_ht = jnp.concatenate([w2[:, 3 * d_k:], w3[:, 3 * d_k:]], axis=0).T
    w4_h = w4[:, :d_k].T
    w4_lg = w4[:, d_k:2 * d_k].T
    w5_h = w5[:, d_e:].T

    step_map = lambda b, t: (t, b, 0)
    step1_map = lambda b, t: (t + 1, b, 0)
    fixed_map = lambda b, t: (0, 0)

    in_specs = [
        pl.BlockSpec((1, tb, 2 * d_k), step_map),        # proj23[t]
        pl.BlockSpec((1, tb, d_k), step_map),            # proj4[t]
        pl.BlockSpec((1, tb, d_k), step_map),            # proj5[t]
        pl.BlockSpec((1, tb, n_skill), step_map),        # q[t]
        pl.BlockSpec((1, tb, n_skill), step1_map),       # q[t+1]
        pl.BlockSpec((n_skill, d_k), fixed_map),         # h0 (resident)
        pl.BlockSpec((d_k, 2 * d_k), fixed_map),         # w23_ht (resident)
        pl.BlockSpec((d_k, d_k), fixed_map),             # w4_h
        pl.BlockSpec((d_k, d_k), fixed_map),             # w4_lg
        pl.BlockSpec((d_k, d_k), fixed_map),             # w5_h
    ]
    out_spec = pl.BlockSpec((steps, tb), lambda b, t: (0, b))

    flops = (2 * B * steps * d_k * (n_skill * d_k + 4 * d_k)
             + 14 * B * steps * n_skill * d_k)
    transc = B * steps * (n_skill * d_k + 4 * d_k)
    bytes_acc = (4 * B * steps * (4 * d_k + 2 * n_skill)
                 + 4 * B * steps + 4 * d_k * (n_skill + 5 * d_k))

    out = pl.pallas_call(
        lpkt_step_kernel,
        out_shape=jax.ShapeDtypeStruct((steps, B), jnp.float32),
        grid_spec=pltpu.PrefetchScalarGridSpec(
            num_scalar_prefetch=0,
            grid=(nb, steps),
            in_specs=in_specs,
            out_specs=out_spec,
            scratch_shapes=[pltpu.VMEM((tb, n_skill, d_k), jnp.float32),
                            pltpu.VMEM((tb, d_k), jnp.float32)],
        ),
        compiler_params=pltpu.CompilerParams(
            dimension_semantics=("parallel", "arbitrary"),
            vmem_limit_bytes=64 * 1024 * 1024),
        cost_estimate=pl.CostEstimate(flops=int(flops),
                                      transcendentals=int(transc),
                                      bytes_accessed=int(bytes_acc)),
    )(proj23_t, proj4_t, proj5_t, q_tm, q_tm, h0, w23_ht, w4_h, w4_lg, w5_h)

    pred = jnp.zeros((B, L), jnp.float32)
    pred = pred.at[:, 1:].set(jnp.transpose(out, (1, 0)))    # pred[:,0] = 0
    return pred


def lpkt_ref_forward(params, e_data, at_data, a_data, it_data, q_matrix, h0, d_a):
    """Pure-JAX reference mirroring the PyTorch forward (eval mode)."""
    B, L = e_data.shape
    n_skill, d_k = q_matrix.shape[1], h0.shape[1]
    e_emb = params['e_embed'][e_data]
    at_emb = params['at_embed'][at_data]
    it_emb = params['it_embed'][it_data]
    a_rep = jnp.broadcast_to(a_data[..., None].astype(jnp.float32), (B, L, d_a))
    x1 = jnp.concatenate([e_emb, at_emb, a_rep], axis=2)
    all_learning = jnp.einsum('bli,oi->blo', x1, params['w1']) + params['b1']
    q_seq = q_matrix[e_data]
    h = jnp.broadcast_to(h0[None], (B,) + h0.shape)
    learning_pre = jnp.zeros((B, d_k), jnp.float32)
    pred = jnp.zeros((B, L), jnp.float32)
    h_tilde_pre = None
    for t in range(L - 1):
        q_e = q_seq[:, t]
        it = it_emb[:, t]
        if h_tilde_pre is None:
            h_tilde_pre = jnp.einsum('bs,bsd->bd', q_e, h)
        learning = all_learning[:, t]
        cat = jnp.concatenate([learning_pre, it, learning, h_tilde_pre], axis=1)
        learning_gain = jnp.tanh(cat @ params['w2'].T + params['b2'])
        gamma_l = jax.nn.sigmoid(cat @ params['w3'].T + params['b3'])
        LG = gamma_l * ((learning_gain + 1.0) / 2.0)
        LG_tilde = q_e[:, :, None] * LG[:, None, :]
        cat4 = jnp.concatenate(
            [h,
             jnp.broadcast_to(LG[:, None, :], (B, n_skill, d_k)),
             jnp.broadcast_to(it[:, None, :], (B, n_skill, d_k))], axis=2)
        gamma_f = jax.nn.sigmoid(jnp.einsum('bsi,oi->bso', cat4, params['w4'])
                                 + params['b4'])
        h = LG_tilde + gamma_f * h
        h_tilde = jnp.einsum('bs,bsd->bd', q_seq[:, t + 1], h)
        y_lin = (jnp.concatenate([e_emb[:, t + 1], h_tilde], axis=1)
                 @ params['w5'].T + params['b5'])
        y = jnp.sum(jax.nn.sigmoid(y_lin), axis=1) / d_k
        pred = pred.at[:, t + 1].set(y)
        learning_pre = learning
        h_tilde_pre = h_tilde
    return pred


def _xavier(key, shape):
    fan_sum = shape[0] + shape[1]
    bound = (6.0 / fan_sum) ** 0.5
    return jax.random.uniform(key, shape, jnp.float32, -bound, bound)


def _bias(key, fan_out, fan_in):
    bound = 1.0 / (fan_in ** 0.5)
    return jax.random.uniform(key, (fan_out,), jnp.float32, -bound, bound)


if __name__ == "__main__":
    key = jax.random.PRNGKey(0)
    B, L = 2, 8
    d_k = 32
    d_e = 32          # forward semantics require d_e == d_k
    d_a = 8
    n_at, n_it, n_exercise, n_question = 6, 6, 10, 10
    n_skill = n_question + 1

    ks = jax.random.split(key, 24)
    params = {
        'e_embed':  _xavier(ks[0], (n_exercise + 10, d_k)),
        'at_embed': _xavier(ks[1], (n_at + 10, d_k)),
        'it_embed': _xavier(ks[2], (n_it + 10, d_k)),
        'w1': _xavier(ks[3], (d_k, d_a + d_e + d_k)),
        'b1': _bias(ks[4], d_k, d_a + d_e + d_k),
        'w2': _xavier(ks[5], (d_k, 4 * d_k)),
        'b2': _bias(ks[6], d_k, 4 * d_k),
        'w3': _xavier(ks[7], (d_k, 4 * d_k)),
        'b3': _bias(ks[8], d_k, 4 * d_k),
        'w4': _xavier(ks[9], (d_k, 3 * d_k)),
        'b4': _bias(ks[10], d_k, 3 * d_k),
        'w5': _xavier(ks[11], (d_k, d_e + d_k)),
        'b5': _bias(ks[12], d_k, d_e + d_k),
    }
    q_matrix = (jax.random.uniform(ks[13], (n_exercise + 10, n_skill)) > 0.6
                ).astype(jnp.float32)
    q_matrix = q_matrix.at[:, 0].set(1.0)          # no all-zero rows
    h0 = _xavier(ks[14], (n_skill, d_k))           # xavier init of h_pre

    e_data = jax.random.randint(ks[15], (B, L), 0, n_exercise, dtype=jnp.int32)
    at_data = jax.random.randint(ks[16], (B, L), 0, n_at, dtype=jnp.int32)
    it_data = jax.random.randint(ks[17], (B, L), 0, n_it, dtype=jnp.int32)
    a_data = jax.random.randint(ks[18], (B, L), 0, 2, dtype=jnp.int32
                                ).astype(jnp.float32)

    fwd = jax.jit(lpkt_forward, static_argnums=(7,))
    pred = fwd(params, e_data, at_data, a_data, it_data, q_matrix, h0, d_a)
    pred = jax.block_until_ready(pred)

    ref = lpkt_ref_forward(params, e_data, at_data, a_data, it_data,
                           q_matrix, h0, d_a)
    if not jnp.allclose(pred, ref, atol=1e-4, rtol=1e-4):
        raise AssertionError(
            f"mismatch: max abs err = {float(jnp.max(jnp.abs(pred - ref)))}")
    print("KERNEL_OK")
</pallas_src>

<mosaic_0001>
module attributes {stable_mosaic.version = 11 : i64} {
  func.func @lpkt_step_kernel(%arg0: i32, %arg1: i32, %arg2: memref<1x2x64xf32, #tpu.memory_space<vmem>>, %arg3: memref<1x2x32xf32, #tpu.memory_space<vmem>>, %arg4: memref<1x2x32xf32, #tpu.memory_space<vmem>>, %arg5: memref<1x2x11xf32, #tpu.memory_space<vmem>>, %arg6: memref<1x2x11xf32, #tpu.memory_space<vmem>>, %arg7: memref<11x32xf32, #tpu.memory_space<vmem>>, %arg8: memref<32x64xf32, #tpu.memory_space<vmem>>, %arg9: memref<32x32xf32, #tpu.memory_space<vmem>>, %arg10: memref<32x32xf32, #tpu.memory_space<vmem>>, %arg11: memref<32x32xf32, #tpu.memory_space<vmem>>, %arg12: memref<7x2xf32, #tpu.memory_space<vmem>>, %arg13: memref<2x11x32xf32, #tpu.memory_space<vmem>>, %arg14: memref<2x32xf32, #tpu.memory_space<vmem>>) attributes {dimension_semantics = [#tpu.dimension_semantics<parallel>, #tpu.dimension_semantics<arbitrary>], iteration_bounds = array<i64: 1, 7>, scalar_prefetch = 0 : i64, scratch_operands = 2 : i64, tpu.core_type = #tpu.core_type<tc>, window_params = [{transform_indices = @transform_0, window_bounds = array<i64: 1, 2, 64>}, {transform_indices = @transform_1, window_bounds = array<i64: 1, 2, 32>}, {transform_indices = @transform_2, window_bounds = array<i64: 1, 2, 32>}, {transform_indices = @transform_3, window_bounds = array<i64: 1, 2, 11>}, {transform_indices = @transform_4, window_bounds = array<i64: 1, 2, 11>}, {pipeline_mode = #tpu.pipeline_mode<synchronous>, transform_indices = @transform_5, window_bounds = array<i64: 11, 32>}, {pipeline_mode = #tpu.pipeline_mode<synchronous>, transform_indices = @transform_6, window_bounds = array<i64: 32, 64>}, {pipeline_mode = #tpu.pipeline_mode<synchronous>, transform_indices = @transform_7, window_bounds = array<i64: 32, 32>}, {pipeline_mode = #tpu.pipeline_mode<synchronous>, transform_indices = @transform_8, window_bounds = array<i64: 32, 32>}, {pipeline_mode = #tpu.pipeline_mode<synchronous>, transform_indices = @transform_9, window_bounds = array<i64: 32, 32>}, {transform_indices = @transform_10, window_bounds = array<i64: 7, 2>}]} {
    %c0 = arith.constant 0 : index
    %c0_0 = arith.constant 0 : index
    %c0_1 = arith.constant 0 : index
    %0 = vector.load %arg5[%c0, %c0_0, %c0_1] : memref<1x2x11xf32, #tpu.memory_space<vmem>>, vector<1x2x11xf32>
    %1 = vector.shape_cast %0 : vector<1x2x11xf32> to vector<2x11xf32>
    %c0_i32 = arith.constant 0 : i32
    %2 = arith.cmpi eq, %arg1, %c0_i32 : i32
    %3 = arith.extui %2 : i1 to i32
    %c0_i32_2 = arith.constant 0 : i32
    %4 = arith.cmpi ne, %3, %c0_i32_2 : i32
    scf.if %4 {
      %c0_45 = arith.constant 0 : index
      %c0_46 = arith.constant 0 : index
      %73 = vector.load %arg7[%c0_45, %c0_46] : memref<11x32xf32, #tpu.memory_space<vmem>>, vector<11x32xf32>
      %74 = vector.shape_cast %73 : vector<11x32xf32> to vector<1x11x32xf32>
      %75 = vector.shape_cast %74 : vector<1x11x32xf32> to vector<1x11x32xf32>
      %76 = vector.broadcast %75 : vector<1x11x32xf32> to vector<2x11x32xf32>
      %c0_47 = arith.constant 0 : index
      %c0_48 = arith.constant 0 : index
      %c0_49 = arith.constant 0 : index
      %77 = vector.load %arg13[%c0_47, %c0_48, %c0_49] : memref<2x11x32xf32, #tpu.memory_space<vmem>>, vector<2x11x32xf32>
      tpu.vector_store %arg13[%c0_47, %c0_48, %c0_49], %76 {strides = array<i32>} : memref<2x11x32xf32, #tpu.memory_space<vmem>>, vector<2x11x32xf32>,
      %cst_50 = arith.constant dense<0.000000e+00> : vector<2x32xf32>
      %78 = tpu.matmul %1, %73, %cst_50 {dimension_numbers = #tpu.dot_dimension_numbers<[1], [0], [0], [1], [0, 0, 1, 1], [], []>} : vector<2x11xf32>, vector<11x32xf32>, vector<2x32xf32> -> vector<2x32xf32>
      %c0_51 = arith.constant 0 : index
      %c0_52 = arith.constant 0 : index
      %79 = vector.load %arg14[%c0_51, %c0_52] : memref<2x32xf32, #tpu.memory_space<vmem>>, vector<2x32xf32>
      tpu.vector_store %arg14[%c0_51, %c0_52], %78 {strides = array<i32>} : memref<2x32xf32, #tpu.memory_space<vmem>>, vector<2x32xf32>,
    } else {
    }
    %c0_3 = arith.constant 0 : index
    %c0_4 = arith.constant 0 : index
    %5 = vector.load %arg14[%c0_3, %c0_4] : memref<2x32xf32, #tpu.memory_space<vmem>>, vector<2x32xf32>
    %c0_5 = arith.constant 0 : index
    %c0_6 = arith.constant 0 : index
    %c0_7 = arith.constant 0 : index
    %6 = vector.load %arg2[%c0_5, %c0_6, %c0_7] : memref<1x2x64xf32, #tpu.memory_space<vmem>>, vector<1x2x64xf32>
    %7 = vector.shape_cast %6 : vector<1x2x64xf32> to vector<2x64xf32>
    %c0_8 = arith.constant 0 : index
    %c0_9 = arith.constant 0 : index
    %8 = vector.load %arg8[%c0_8, %c0_9] : memref<32x64xf32, #tpu.memory_space<vmem>>, vector<32x64xf32>
    %cst = arith.constant dense<0.000000e+00> : vector<2x64xf32>
    %9 = tpu.matmul %5, %8, %cst {dimension_numbers = #tpu.dot_dimension_numbers<[1], [0], [0], [1], [0, 0, 1, 1], [], []>} : vector<2x32xf32>, vector<32x64xf32>, vector<2x64xf32> -> vector<2x64xf32>
    %10 = arith.addf %7, %9 : vector<2x64xf32>
    %11 = vector.extract_strided_slice %10 {offsets = [0, 0], sizes = [2, 32], strides = [1, 1]} : vector<2x64xf32> to vector<2x32xf32>
    %12 = vector.extract_strided_slice %10 {offsets = [0, 32], sizes = [2, 32], strides = [1, 1]} : vector<2x64xf32> to vector<2x32xf32>
    %13 = arith.negf %12 : vector<2x32xf32>
    %14 = math.exp %13 : vector<2x32xf32>
    %cst_10 = arith.constant 1.000000e+00 : f32
    %15 = vector.broadcast %cst_10 : f32 to vector<2x32xf32>
    %16 = arith.addf %15, %14 : vector<2x32xf32>
    %17 = arith.divf %15, %16 : vector<2x32xf32>
    %cst_11 = arith.constant 2.000000e+00 : f32
    %18 = vector.broadcast %cst_11 : f32 to vector<2x32xf32>
    %19 = arith.mulf %18, %11 : vector<2x32xf32>
    %20 = arith.negf %19 : vector<2x32xf32>
    %21 = math.exp %20 : vector<2x32xf32>
    %cst_12 = arith.constant 1.000000e+00 : f32
    %22 = vector.broadcast %cst_12 : f32 to vector<2x32xf32>
    %23 = arith.addf %22, %21 : vector<2x32xf32>
    %24 = arith.divf %22, %23 : vector<2x32xf32>
    %25 = arith.mulf %17, %24 : vector<2x32xf32>
    %c0_13 = arith.constant 0 : index
    %c0_14 = arith.constant 0 : index
    %c0_15 = arith.constant 0 : index
    %26 = vector.load %arg13[%c0_13, %c0_14, %c0_15] : memref<2x11x32xf32, #tpu.memory_space<vmem>>, vector<2x11x32xf32>
    %c0_16 = arith.constant 0 : index
    %c0_17 = arith.constant 0 : index
    %27 = vector.load %arg9[%c0_16, %c0_17] : memref<32x32xf32, #tpu.memory_space<vmem>>, vector<32x32xf32>
    %cst_18 = arith.constant dense<0.000000e+00> : vector<2x11x32xf32>
    %28 = tpu.matmul %26, %27, %cst_18 {dimension_numbers = #tpu.dot_dimension_numbers<[2], [0], [0, 1], [1], [0, 0, 0, 1, 1, 1], [], []>} : vector<2x11x32xf32>, vector<32x32xf32>, vector<2x11x32xf32> -> vector<2x11x32xf32>
    %c0_19 = arith.constant 0 : index
    %c0_20 = arith.constant 0 : index
    %29 = vector.load %arg10[%c0_19, %c0_20] : memref<32x32xf32, #tpu.memory_space<vmem>>, vector<32x32xf32>
    %cst_21 = arith.constant dense<0.000000e+00> : vector<2x32xf32>
    %30 = tpu.matmul %25, %29, %cst_21 {dimension_numbers = #tpu.dot_dimension_numbers<[1], [0], [0], [1], [0, 0, 1, 1], [], []>} : vector<2x32xf32>, vector<32x32xf32>, vector<2x32xf32> -> vector<2x32xf32>
    %c0_22 = arith.constant 0 : index
    %c0_23 = arith.constant 0 : index
    %c0_24 = arith.constant 0 : index
    %31 = vector.load %arg3[%c0_22, %c0_23, %c0_24] : memref<1x2x32xf32, #tpu.memory_space<vmem>>, vector<1x2x32xf32>
    %32 = vector.shape_cast %31 : vector<1x2x32xf32> to vector<2x32xf32>
    %33 = arith.addf %30, %32 : vector<2x32xf32>
    %34 = vector.shape_cast %33 : vector<2x32xf32> to vector<2x1x32xf32>
    %35 = vector.broadcast %34 : vector<2x1x32xf32> to vector<2x11x32xf32>
    %36 = arith.addf %28, %35 : vector<2x11x32xf32>
    %37 = arith.negf %36 : vector<2x11x32xf32>
    %38 = math.exp %37 : vector<2x11x32xf32>
    %cst_25 = arith.constant 1.000000e+00 : f32
    %39 = vector.broadcast %cst_25 : f32 to vector<2x11x32xf32>
    %40 = arith.addf %39, %38 : vector<2x11x32xf32>
    %41 = arith.divf %39, %40 : vector<2x11x32xf32>
    %42 = vector.shape_cast %1 : vector<2x11xf32> to vector<2x11x1xf32>
    %43 = vector.shape_cast %25 : vector<2x32xf32> to vector<2x1x32xf32>
    %44 = vector.broadcast %42 : vector<2x11x1xf32> to vector<2x11x32xf32>
    %45 = vector.broadcast %43 : vector<2x1x32xf32> to vector<2x11x32xf32>
    %46 = arith.mulf %44, %45 : vector<2x11x32xf32>
    %47 = arith.mulf %41, %26 : vector<2x11x32xf32>
    %48 = arith.addf %46, %47 : vector<2x11x32xf32>
    %c0_26 = arith.constant 0 : index
    %c0_27 = arith.constant 0 : index
    %c0_28 = arith.constant 0 : index
    %49 = vector.load %arg13[%c0_26, %c0_27, %c0_28] : memref<2x11x32xf32, #tpu.memory_space<vmem>>, vector<2x11x32xf32>
    tpu.vector_store %arg13[%c0_26, %c0_27, %c0_28], %48 {strides = array<i32>} : memref<2x11x32xf32, #tpu.memory_space<vmem>>, vector<2x11x32xf32>,
    %c0_29 = arith.constant 0 : index
    %c0_30 = arith.constant 0 : index
    %c0_31 = arith.constant 0 : index
    %50 = vector.load %arg6[%c0_29, %c0_30, %c0_31] : memref<1x2x11xf32, #tpu.memory_space<vmem>>, vector<1x2x11xf32>
    %51 = vector.shape_cast %50 : vector<1x2x11xf32> to vector<2x11xf32>
    %52 = vector.shape_cast %51 : vector<2x11xf32> to vector<2x11x1xf32>
    %53 = vector.broadcast %52 : vector<2x11x1xf32> to vector<2x11x32xf32>
    %54 = arith.mulf %53, %48 : vector<2x11x32xf32>
    %cst_32 = arith.constant dense<0.000000e+00> : vector<2x32xf32>
    %55 = vector.multi_reduction <add>, %54, %cst_32 [1] : vector<2x11x32xf32> to vector<2x32xf32>
    %c0_33 = arith.constant 0 : index
    %c0_34 = arith.constant 0 : index
    %56 = vector.load %arg14[%c0_33, %c0_34] : memref<2x32xf32, #tpu.memory_space<vmem>>, vector<2x32xf32>
    tpu.vector_store %arg14[%c0_33, %c0_34], %55 {strides = array<i32>} : memref<2x32xf32, #tpu.memory_space<vmem>>, vector<2x32xf32>,
    %c0_35 = arith.constant 0 : index
    %c0_36 = arith.constant 0 : index
    %c0_37 = arith.constant 0 : index
    %57 = vector.load %arg4[%c0_35, %c0_36, %c0_37] : memref<1x2x32xf32, #tpu.memory_space<vmem>>, vector<1x2x32xf32>
    %58 = vector.shape_cast %57 : vector<1x2x32xf32> to vector<2x32xf32>
    %c0_38 = arith.constant 0 : index
    %c0_39 = arith.constant 0 : index
    %59 = vector.load %arg11[%c0_38, %c0_39] : memref<32x32xf32, #tpu.memory_space<vmem>>, vector<32x32xf32>
    %cst_40 = arith.constant dense<0.000000e+00> : vector<2x32xf32>
    %60 = tpu.matmul %55, %59, %cst_40 {dimension_numbers = #tpu.dot_dimension_numbers<[1], [0], [0], [1], [0, 0, 1, 1], [], []>} : vector<2x32xf32>, vector<32x32xf32>, vector<2x32xf32> -> vector<2x32xf32>
    %61 = arith.addf %58, %60 : vector<2x32xf32>
    %62 = arith.negf %61 : vector<2x32xf32>
    %63 = math.exp %62 : vector<2x32xf32>
    %cst_41 = arith.constant 1.000000e+00 : f32
    %64 = vector.broadcast %cst_41 : f32 to vector<2x32xf32>
    %65 = arith.addf %64, %63 : vector<2x32xf32>
    %66 = arith.divf %64, %65 : vector<2x32xf32>
    %cst_42 = arith.constant dense<0.000000e+00> : vector<2xf32>
    %67 = vector.multi_reduction <add>, %66, %cst_42 [1] : vector<2x32xf32> to vector<2xf32>
    %cst_43 = arith.constant 3.125000e-02 : f32
    %68 = vector.broadcast %cst_43 : f32 to vector<2xf32>
    %69 = arith.mulf %67, %68 : vector<2xf32>
    %70 = vector.shape_cast %69 : vector<2xf32> to vector<1x2xf32>
    %71 = arith.index_cast %arg1 : i32 to index
    %c0_44 = arith.constant 0 : index
    %72 = vector.load %arg12[%71, %c0_44] : memref<7x2xf32, #tpu.memory_space<vmem>>, vector<1x2xf32>
    tpu.vector_store %arg12[%71, %c0_44], %70 {strides = array<i32>} : memref<7x2xf32, #tpu.memory_space<vmem>>, vector<1x2xf32>,
    return
  }
  func.func @transform_0(%arg0: i32, %arg1: i32) -> (i32, i32, i32) {
    %c0_i32 = arith.constant 0 : i32
    %c0_i32_0 = arith.constant 0 : i32
    return %arg1, %arg0, %c0_i32 : i32, i32, i32
  }
  func.func @transform_1(%arg0: i32, %arg1: i32) -> (i32, i32, i32) {
    %c0_i32 = arith.constant 0 : i32
    %c0_i32_0 = arith.constant 0 : i32
    return %arg1, %arg0, %c0_i32 : i32, i32, i32
  }
  func.func @transform_2(%arg0: i32, %arg1: i32) -> (i32, i32, i32) {
    %c0_i32 = arith.constant 0 : i32
    %c0_i32_0 = arith.constant 0 : i32
    return %arg1, %arg0, %c0_i32 : i32, i32, i32
  }
  func.func @transform_3(%arg0: i32, %arg1: i32) -> (i32, i32, i32) {
    %c0_i32 = arith.constant 0 : i32
    %c0_i32_0 = arith.constant 0 : i32
    return %arg1, %arg0, %c0_i32 : i32, i32, i32
  }
  func.func @transform_4(%arg0: i32, %arg1: i32) -> (i32, i32, i32) {
    %c1_i32 = arith.constant 1 : i32
    %0 = arith.addi %arg1, %c1_i32 : i32
    %c0_i32 = arith.constant 0 : i32
    %c0_i32_0 = arith.constant 0 : i32
    return %0, %arg0, %c0_i32 : i32, i32, i32
  }
  func.func @transform_5(%arg0: i32, %arg1: i32) -> (i32, i32) {
    %c0_i32 = arith.constant 0 : i32
    %c0_i32_0 = arith.constant 0 : i32
    %c0_i32_1 = arith.constant 0 : i32
    return %c0_i32, %c0_i32_0 : i32, i32
  }
  func.func @transform_6(%arg0: i32, %arg1: i32) -> (i32, i32) {
    %c0_i32 = arith.constant 0 : i32
    %c0_i32_0 = arith.constant 0 : i32
    %c0_i32_1 = arith.constant 0 : i32
    return %c0_i32, %c0_i32_0 : i32, i32
  }
  func.func @transform_7(%arg0: i32, %arg1: i32) -> (i32, i32) {
    %c0_i32 = arith.constant 0 : i32
    %c0_i32_0 = arith.constant 0 : i32
    %c0_i32_1 = arith.constant 0 : i32
    return %c0_i32, %c0_i32_0 : i32, i32
  }
  func.func @transform_8(%arg0: i32, %arg1: i32) -> (i32, i32) {
    %c0_i32 = arith.constant 0 : i32
    %c0_i32_0 = arith.constant 0 : i32
    %c0_i32_1 = arith.constant 0 : i32
    return %c0_i32, %c0_i32_0 : i32, i32
  }
  func.func @transform_9(%arg0: i32, %arg1: i32) -> (i32, i32) {
    %c0_i32 = arith.constant 0 : i32
    %c0_i32_0 = arith.constant 0 : i32
    %c0_i32_1 = arith.constant 0 : i32
    return %c0_i32, %c0_i32_0 : i32, i32
  }
  func.func @transform_10(%arg0: i32, %arg1: i32) -> (i32, i32) {
    %c0_i32 = arith.constant 0 : i32
    %c0_i32_0 = arith.constant 0 : i32
    return %c0_i32, %arg0 : i32, i32
  }
}

</mosaic_0001>

<bundles_post_ra>
// kernel: lpkt_forward.1
= control target key start
LH: loop header
LB: loop body
LE: loop exit
PB: predicated region body
PF: predicated region fallthrough
CT: control target
= control target key end

     0   :  { %s4250_s0 = inlined_call_operand.hbm [shape: f32[7,2,64], index: 0, kind: input, shape index: {}]   ;;  %s4251_s1 = inlined_call_operand.hbm [shape: f32[7,2,32], index: 1, kind: input, shape index: {}]   ;;  %s4252_s2 = inlined_call_operand.hbm [shape: f32[7,2,32], index: 2, kind: input, shape index: {}]   ;;  %s4253_s3 = inlined_call_operand.hbm [shape: f32[8,2,11], index: 3, kind: input, shape index: {}, may-alias: {3,4}]   ;;  %s4254_s4 = inlined_call_operand.hbm [shape: f32[8,2,11], index: 4, kind: input, shape index: {}, may-alias: {3,4}]   ;;  %s4255_s5 = inlined_call_operand.hbm [shape: f32[11,32], index: 5, kind: input, shape index: {}]   ;;  %s4256_s6 = inlined_call_operand.hbm [shape: f32[32,64], index: 6, kind: input, shape index: {}]   ;;  %s4257_s7 = inlined_call_operand.hbm [shape: f32[32,32], index: 7, kind: input, shape index: {}]   ;;  %s4258_s8 = inlined_call_operand.hbm [shape: f32[32,32], index: 8, kind: input, shape index: {}]   ;;  %s4259_s9 = inlined_call_operand.hbm [shape: f32[32,32], index: 9, kind: input, shape index: {}]   ;;  %s4260_s10 = inlined_call_operand.hbm [shape: f32[7,2], index: 10, kind: output, shape index: {}]  }
   0x1   :  { %4294 = sst [smem:[#allocation41_spill]] %s4251_s1 }
   0x2   :  { %4295 = sst [smem:[#allocation42_spill]] %s4253_s3 }
   0x3   :  { %4296 = sst [smem:[#allocation43_spill]] %s4254_s4 }
   0x4   :  { %4297 = sst [smem:[#allocation44_spill]] %s4255_s5 }
   0x5   :  { %4298 = sst [smem:[#allocation45_spill]] %s4257_s7 }
   0x6   :  { %4299 = sst [smem:[#allocation46_spill]] %s4260_s10 }
   0x7   :  { %15 = vsyncpa [#allocation5], 0 }
   0x8   :  { %17 = vsyncpa [#allocation5 + $0x1], 0 }
   0x9   :  { %18 = vsyncpa [#allocation8], 0 }
   0xa   :  { %20 = vsyncpa [#allocation8 + $0x1], 0 }
   0xb   :  { %21 = vsyncpa [#allocation11], 0 }
   0xc   :  { %23 = vsyncpa [#allocation11 + $0x1], 0 }
   0xd   :  { %24 = vsyncpa [#allocation14], 0 }
   0xe   :  { %25 = vsyncpa [#allocation17], 0 }
   0xf   :  { %26 = vsyncpa [#allocation20], 0 }
  0x10   :  { %27 = vsyncpa [#allocation6], 0  ;;  %s3446_s13 = smov 0   ;;  %s3448_s14 = smov 0  }
  0x11   :  { %s3450_s15 = smov 0   ;;  %s3452_s16 = smov 0  }
  0x12   :  { %s3454_s17 = smov 0   ;;  %s3456_s18 = smov 0  }
  0x13   :  { %s3458_s19 = smov 0   ;;  %s3460_s20 = smov 0  }
  0x14   :  { %s3462_s21 = smov 0  }
  0x15 LB: > { %4300 = sst [smem:[#allocation30_spill]] %s3334_s13  ;;  %s3492_s22 = sadd.s32 4294967295, %s3366_s21   ;;  %s3366_s21 = sphi %s3462_s21, %s33_s21   ;;  %s3362_s20 = sphi %s3460_s20, %s4364_s20   ;;  %s3358_s19 = sphi %s3458_s19, %s4363_s19   ;;  %s3354_s18 = sphi %s3456_s18, %s4368_s18   ;;  %s3350_s17 = sphi %s3454_s17, %s4367_s17   ;;  %s3346_s16 = sphi %s3452_s16, %s4361_s16   ;;  %s3342_s15 = sphi %s3450_s15, %s4366_s15   ;;  %s3338_s14 = sphi %s3448_s14, %s4365_s14   ;;  %s3334_s13 = sphi %s3446_s13, %s4360_s13  }
  0x16   : > { %4301 = sst [smem:[#allocation31_spill]] %s3338_s14  ;;  %p2494_p0 = scmp.ge.s32.totalorder %s3366_s21, 1 }
  0x17   : > { %4302 = sst [smem:[#allocation32_spill]] %s3350_s17  ;;  %p4262_p1 = scmp.eq.s32.totalorder %s3492_s22, 0 }
  0x18   : > { %4303 = sst [smem:[#allocation33_spill]] %s3358_s19  ;;  %p323_p2 = scmp.lt.s32.totalorder %s3366_s21, 8 }
  0x19   : > { %4304 = sst [smem:[#allocation34_spill]] %s3362_s20  ;;  %s3368_s24 = smov [#allocation13]  }
  0x1a   : > { %4305 = sst [smem:[#allocation35_spill]] %s3492_s22  ;;  %p3497_p3 = pnand %p2494_p0, %p323_p2 }
  0x1b   : > { %s335_s25 = sshll.u32 %s3368_s24, 4  ;;  %s3369_s27 = smov [#allocation16]   ;;  %s336_s25 = int_to_ptr.vmem [resolvable:$true] %s335_s25 }
  0x1c   : > { %s4306_s23 = scalar_select %p3497_p3, 1, 0 }
  0x1d   : > { %p2710_p4 = pneg %p3497_p3  ;;  %s361_s28 = sshll.u32 %s3369_s27, 4  ;;  %s3509_s28 = int_to_ptr.vmem [resolvable:$true] %s361_s28 }
  0x1e   : > { %4307 = sst [smem:[#allocation36_spill]] %s4306_s23  ;;  %s4309_s5 = sld [smem:[#allocation44_spill]] }
  0x1f   : > { %p3505_p5 = pnand %p2710_p4, %p4262_p1 }
  0x21   : > { %s4308_s26 = scalar_select %p3505_p5, 1, 0 }
  0x22   : > { %p3519_p7 = pneg %p3505_p5 }
  0x24   : > { %s2947_s11 = scalar_lea.hbm %s4309_s5, 256 }
  0x25   : > { %p2948_p6 = scmp.ne.s32.totalorder %s4309_s5, %s2947_s11  ;;  %p2954_p10 = scmp.lt.u32.totalorder %s2947_s11, %s4309_s5 }
  0x26   : > { %s4310_s24 = scalar_select %p3519_p7, 1, 0 }
  0x27   : > { %p2950_p8 = pnand %p3519_p7, %p2948_p6 }
  0x29   : > { %p2951_p9 = pneg %p2950_p8 }
  0x2b   : > { %p2956_p11 = pnand %p2954_p10, %p2951_p9 }
  0x2d   : > { %2959 = shalt.err (!%p2956_p11)
}
  0x2e   : > { %s2960_s29 = scalar_lea.vmem %s336_s25, 256  ;;  %p2968_p2 = scmp.lt.s32.totalorder %s336_s25, %s336_s25 }
  0x2f   : > { %p2961_p12 = scmp.ne.s32.totalorder %s336_s25, %s2960_s29  ;;  %p2969_p4 = scmp.lt.s32.totalorder %s2960_s29, %s2960_s29 }
  0x31   : > { %p2963_p13 = pnand %p2961_p12, %p3519_p7  ;;  %p2970_p1 = por %p2969_p4, %p2968_p2 }
  0x33   : > { %p2964_p0 = pneg %p2963_p13 }
  0x35   : > { %p2971_p3 = pnand %p2970_p1, %p2964_p0 }
  0x37   : > { %2974 = shalt.err (!%p2971_p3)
}
  0x38   : > { %s4267_s10 = smov 128   ;;  %s4270_s30 = smov 8  }
  0x39   : > { %2713 = dma.hbm_to_vmem [thread:$0]  (!%p3505_p5), %s4309_s5, 256, %s336_s25, [#allocation14], %s4267_s10, %s4267_s10, %s4270_s30  }
  0x3a   : > { %s4311_s7 = sld [smem:[#allocation45_spill]] }
  0x40   : > { %s2975_s23 = scalar_lea.hbm %s4311_s7, 512 }
  0x41   : > { %p2976_p1 = scmp.ne.s32.totalorder %s4311_s7, %s2975_s23  ;;  %p2982_p8 = scmp.lt.u32.totalorder %s2975_s23, %s4311_s7 }
  0x43   : > { %p2978_p3 = pnand %p2976_p1, %p3519_p7 }
  0x45   : > { %p2979_p6 = pneg %p2978_p3 }
  0x47   : > { %p2984_p9 = pnand %p2982_p8, %p2979_p6 }
  0x49   : > { %2987 = shalt.err (!%p2984_p9)
}
  0x4a   : > { %s2988_s25 = scalar_lea.vmem %s3509_s28, 512  ;;  %p2996_p13 = scmp.lt.s32.totalorder %s3509_s28, %s3509_s28 }
  0x4b   : > { %p2989_p10 = scmp.ne.s32.totalorder %s3509_s28, %s2988_s25  ;;  %p2997_p0 = scmp.lt.s32.totalorder %s2988_s25, %s2988_s25 }
  0x4d   : > { %p2991_p11 = pnand %p2989_p10, %p3519_p7  ;;  %p2998_p2 = por %p2997_p0, %p2996_p13 }
  0x4f   : > { %p2992_p12 = pneg %p2991_p11 }
  0x51   : > { %p2999_p4 = pnand %p2998_p2, %p2992_p12 }
  0x53   : > { %3002 = shalt.err (!%p2999_p4)
}
  0x54   : > { %2719 = dma.hbm_to_vmem [thread:$0]  (!%p3505_p5), %s4311_s7, 512, %s3509_s28, [#allocation17], %s4267_s10, %s4267_s10, %s4270_s30  }
  0x55   : > { %s42_s14 = sadd.s32 1, %s3362_s20  ;;  %s54_s23 = sadd.s32 1, %s3354_s18 }
  0x56   : > { %p43_p1 = scmp.ge.s32.totalorder %s42_s14, 7  ;;  %p61_p3 = scmp.ne.s32.totalorder %s3354_s18, %s3350_s17 }
  0x57   : > { %p4275_p6 = scmp.eq.s32.totalorder %s3366_s21, 0  ;;  %p67_p8 = scmp.ne.s32.totalorder %s3350_s17, %s3346_s16 }
  0x58   : > { %s3571_s19 = scalar_select %p43_p1, 0, %s42_s14  }
  0x59   : > { %p63_p9 = por %p4275_p6, %p61_p3  ;;  %p4313_p10 = scmp.eq.s32.totalorder %s3492_s22, 0 }
  0x5a   : > { %4312 = sst [smem:[#allocation37_spill]] %s3571_s19  ;;  %s49_s11 = ssub.s32 %s3362_s20, %s3571_s19 }
  0x5b   : > { %p3577_p11 = por %p4313_p10, %p67_p8  ;;  %s162_s12 = sadd.s32 1, %s3571_s19 }
  0x5c   : > { %p52_p12 = scmp.eq.s32.totalorder %s49_s11, 0  ;;  %s3584_s27 = ssub.s32 %s42_s14, %s162_s12 }
  0x5d   : > { %s4314_s28 = scalar_select %p3577_p11, 1, 0 }
  0x5e   : > { %p4274_p0 = scmp.lt.s32.totalorder %s3366_s21, 7  ;;  %s4269_s29 = sand.u32 1, %s3354_s18  }
  0x5f   : > { %4315 = sst [smem:[#allocation38_spill]] %s4314_s28  ;;  %s3593_s25 = sshll.u32 %s3362_s20, 5 }
  0x60   : > { %s3589_s16 = scalar_select %p52_p12, %s3354_s18, %s54_s23  }
  0x61   : > { %s3597_s4 = sshll.u32 %s4269_s29, 1  ;;  %p3601_p2 = pnand %p4274_p0, %p63_p9 }
  0x62   : > { %4316 = sst [smem:[#allocation39_spill]] %s3589_s16  ;;  %s4276_s14 = sand.u32 1, %s3366_s21  }
  0x63   : > { %s4317_s13 = scalar_select %p3601_p2, 1, 0 }
  0x64   : > { %s4318_s1 = sld [smem:[#allocation41_spill]]  ;;  %s424_s10 = scalar_lea.vmem [#allocation7], %s3597_s4 }
  0x65   : > { %s432_s29 = sshll.u32 %s424_s10, 4  ;;  %s3617_s30 = scalar_lea.sflag [#allocation8], %s4276_s14  ;;  %s3613_s29 = int_to_ptr.vmem [resolvable:$true] %s432_s29 }
  0x66   : > { %p3623_p1 = pneg %p3601_p2 }
  0x68   : > { %s4319_s7 = scalar_select %p3623_p1, 1, 0 }
  0x6a   : > { %s3610_s23 = scalar_lea.hbm %s4318_s1, %s3593_s25  ;;  %s3008_s10 = scalar_lea.hbm %s4318_s1, 224 }
  0x6b   : > { %s3003_s5 = scalar_lea.hbm %s3610_s23, 32  ;;  %p3009_p9 = scmp.lt.u32.totalorder %s3610_s23, %s4318_s1 }
  0x6c   : > { %p3004_p4 = scmp.ne.s32.totalorder %s3610_s23, %s3003_s5  ;;  %p3010_p10 = scmp.lt.u32.totalorder %s3008_s10, %s3003_s5 }
  0x6d   : > { %p3012_p0 = scmp.lt.u32.totalorder %s3003_s5, %s3610_s23 }
  0x6e   : > { %p3006_p3 = pnand %p3623_p1, %p3004_p4  ;;  %p3011_p12 = por %p3010_p10, %p3009_p9 }
  0x70   : > { %p3007_p8 = pneg %p3006_p3  ;;  %p3013_p6 = por %p3012_p0, %p3011_p12 }
  0x72   : > { %p3014_p13 = pnand %p3013_p6, %p3007_p8 }
  0x74   : > { %3017 = shalt.err (!%p3014_p13)
}
  0x75   : > { %s3018_s14 = scalar_lea.vmem %s3613_s29, 32  ;;  %s3372_s11 = smov [#allocation7]  }
  0x76   : > { %p3019_p4 = scmp.ne.s32.totalorder %s3613_s29, %s3018_s14  ;;  %s3023_s12 = sshll.u32 %s3372_s11, 4  ;;  %s3024_s12 = int_to_ptr.vmem [resolvable:$false] %s3023_s12 }
  0x77   : > { %s3025_s20 = scalar_lea.vmem %s3024_s12, 64  ;;  %p3026_p5 = scmp.lt.s32.totalorder %s3613_s29, %s3024_s12 }
  0x78   : > { %p3021_p3 = pnand %p3019_p4, %p3623_p1  ;;  %p3027_p7 = scmp.lt.s32.totalorder %s3025_s20, %s3018_s14 }
  0x7a   : > { %p3022_p11 = pneg %p3021_p3  ;;  %p3028_p9 = por %p3027_p7, %p3026_p5 }
  0x7c   : > { %p3029_p10 = pnand %p3028_p9, %p3022_p11 }
  0x7e   : > { %3032 = shalt.err (!%p3029_p10)
}
  0x7f   : > { %2732 = dma.hbm_to_vmem [thread:$0]  (!%p3601_p2), %s3610_s23, 32, %s3613_s29, %s3617_s30  }
  0x80   : > { %s4320_s3 = sld [smem:[#allocation42_spill]]  ;;  %s462_s14 = scalar_lea.vmem [#allocation10], %s3597_s4 }
  0x81   : > { %s470_s11 = sshll.u32 %s462_s14, 4  ;;  %s3373_s12 = smov [#allocation15]   ;;  %s3654_s11 = int_to_ptr.vmem [resolvable:$true] %s470_s11 }
  0x82   : > { %s3656_s20 = sshll.u32 %s3373_s12, 4  ;;  %s4321_s1 = sand.u32 1, %s3366_s21   ;;  %s349_s20 = int_to_ptr.vmem [resolvable:$true] %s3656_s20 }
  0x83   : > { %s3660_s16 = scalar_lea.sflag [#allocation11], %s4321_s1 }
  0x84   : > { %4322 = sst [smem:[#allocation40_spill]] %s3660_s16 }
  0x86   : > { %s3651_s10 = scalar_lea.hbm %s4320_s3, %s3593_s25  ;;  %s3038_s19 = scalar_lea.hbm %s4320_s3, 256 }
  0x87   : > { %s3033_s29 = scalar_lea.hbm %s3651_s10, 32  ;;  %p3039_p11 = scmp.lt.u32.totalorder %s3651_s10, %s4320_s3 }
  0x88   : > { %p3034_p5 = scmp.ne.s32.totalorder %s3651_s10, %s3033_s29  ;;  %p3040_p13 = scmp.lt.u32.totalorder %s3038_s19, %s3033_s29 }
  0x89   : > { %p3042_p8 = scmp.lt.u32.totalorder %s3033_s29, %s3651_s10 }
  0x8a   : > { %p3036_p7 = pnand %p3034_p5, %p3623_p1  ;;  %p3041_p0 = por %p3040_p13, %p3039_p11 }
  0x8c   : > { %p3037_p6 = pneg %p3036_p7  ;;  %p3043_p12 = por %p3042_p8, %p3041_p0 }
  0x8e   : > { %p3044_p4 = pnand %p3043_p12, %p3037_p6 }
  0x90   : > { %3047 = shalt.err (!%p3044_p4)
}
  0x91   : > { %s3048_s1 = scalar_lea.vmem %s3654_s11, 32  ;;  %s3374_s14 = smov [#allocation10]  }
  0x92   : > { %p3049_p3 = scmp.ne.s32.totalorder %s3654_s11, %s3048_s1  ;;  %s3053_s12 = sshll.u32 %s3374_s14, 4  ;;  %s3054_s12 = int_to_ptr.vmem [resolvable:$false] %s3053_s12 }
  0x93   : > { %s3055_s17 = scalar_lea.vmem %s3054_s12, 64  ;;  %p3056_p5 = scmp.lt.s32.totalorder %s3654_s11, %s3054_s12 }
  0x94   : > { %p3051_p9 = pnand %p3049_p3, %p3623_p1  ;;  %p3057_p7 = scmp.lt.s32.totalorder %s3055_s17, %s3048_s1 }
  0x96   : > { %p3052_p10 = pneg %p3051_p9  ;;  %p3058_p11 = por %p3057_p7, %p3056_p5 }
  0x98   : > { %p3059_p13 = pnand %p3058_p11, %p3052_p10 }
  0x9a   : > { %3062 = shalt.err (!%p3059_p13)
}
  0x9b   : > { %2738 = dma.hbm_to_vmem [thread:$0]  (!%p3601_p2), %s3651_s10, 32, %s3654_s11, %s3660_s16  }
  0x9c   : > { %s3063_s23 = scalar_lea.hbm %s4256_s6, 512  ;;  %p4323_p0 = scmp.ne.s32.totalorder %s4310_s24, 0 }
  0x9d   : > { %p3064_p6 = scmp.ne.s32.totalorder %s4256_s6, %s3063_s23  ;;  %p3070_p4 = scmp.lt.u32.totalorder %s3063_s23, %s4256_s6 }
  0x9f   : > { %p3066_p8 = pnand %p3064_p6, %p4323_p0 }
  0xa1   : > { %p3067_p12 = pneg %p3066_p8 }
  0xa3   : > { %p3072_p3 = pnand %p3070_p4, %p3067_p12 }
  0xa5   : > { %3075 = shalt.err (!%p3072_p3)
}
  0xa6   : > { %s3076_s12 = scalar_lea.vmem %s349_s20, 512  ;;  %p3084_p7 = scmp.lt.s32.totalorder %s349_s20, %s349_s20 }
  0xa7   : > { %p3077_p9 = scmp.ne.s32.totalorder %s349_s20, %s3076_s12  ;;  %p3085_p11 = scmp.lt.s32.totalorder %s3076_s12, %s3076_s12 }
  0xa9   : > { %p3079_p10 = pnand %p3077_p9, %p4323_p0  ;;  %p3086_p13 = por %p3085_p11, %p3084_p7 }
  0xab   : > { %p3080_p5 = pneg %p3079_p10 }
  0xad   : > { %p3087_p2 = pnand %p3086_p13, %p3080_p5 }
  0xaf   : > { %3090 = shalt.err (!%p3087_p2)
}
  0xb0   : > { %p4324_p6 = scmp.ne.s32.totalorder %s4308_s26, 0  ;;  %s4325_s10 = smov 8  }
  0xb1   : > { %s4326_s11 = smov 128   ;;  %s3375_s29 = smov [#allocation18]  }
  0xb2   : > { %2716 = dma.hbm_to_vmem [thread:$0]  (!%p4324_p6), %s4256_s6, 512, %s349_s20, [#allocation14], %s4326_s11, %s4326_s11, %s4325_s10  }
  0xb3   : > { %s374_s23 = sshll.u32 %s3375_s29, 4  ;;  %s3376_s5 = smov [#allocation19]   ;;  %s375_s23 = int_to_ptr.vmem [resolvable:$true] %s374_s23 }
  0xb4   : > { %s387_s19 = sshll.u32 %s3376_s5, 4  ;;  %s3091_s12 = scalar_lea.hbm %s4258_s8, 512  ;;  %s388_s19 = int_to_ptr.vmem [resolvable:$true] %s387_s19 }
  0xb5   : > { %p3092_p2 = scmp.ne.s32.totalorder %s4258_s8, %s3091_s12  ;;  %p3098_p4 = scmp.lt.u32.totalorder %s3091_s12, %s4258_s8 }
  0xb7   : > { %p3094_p8 = pnand %p3092_p2, %p4323_p0 }
  0xb9   : > { %p3095_p12 = pneg %p3094_p8 }
  0xbb   : > { %p3100_p3 = pnand %p3098_p4, %p3095_p12 }
  0xbd   : > { %3103 = shalt.err (!%p3100_p3)
}
  0xbe   : > { %s3104_s20 = scalar_lea.vmem %s375_s23, 512  ;;  %p3112_p7 = scmp.lt.s32.totalorder %s375_s23, %s375_s23 }
  0xbf   : > { %p3105_p9 = scmp.ne.s32.totalorder %s375_s23, %s3104_s20  ;;  %p3113_p11 = scmp.lt.s32.totalorder %s3104_s20, %s3104_s20 }
  0xc1   : > { %p3107_p10 = pnand %p3105_p9, %p4323_p0  ;;  %p3114_p13 = por %p3113_p11, %p3112_p7 }
  0xc3   : > { %p3108_p5 = pneg %p3107_p10 }
  0xc5   : > { %p3115_p1 = pnand %p3114_p13, %p3108_p5 }
  0xc7   : > { %3118 = shalt.err (!%p3115_p1)
}
  0xc8   : > { %2722 = dma.hbm_to_vmem [thread:$0]  (!%p4324_p6), %s4258_s8, 512, %s375_s23, [#allocation17], %s4326_s11, %s4326_s11, %s4325_s10  }
  0xc9   : > { %s3119_s29 = scalar_lea.hbm %s4259_s9, 512 }
  0xca   : > { %p3120_p2 = scmp.ne.s32.totalorder %s4259_s9, %s3119_s29  ;;  %p3126_p12 = scmp.lt.u32.totalorder %s3119_s29, %s4259_s9 }
  0xcc   : > { %p3122_p1 = pnand %p3120_p2, %p4323_p0 }
  0xce   : > { %p3123_p8 = pneg %p3122_p1 }
  0xd0   : > { %p3128_p4 = pnand %p3126_p12, %p3123_p8 }
  0xd2   : > { %3131 = shalt.err (!%p3128_p4)
}
  0xd3   : > { %s3132_s17 = scalar_lea.vmem %s388_s19, 512  ;;  %p3140_p5 = scmp.lt.s32.totalorder %s388_s19, %s388_s19 }
  0xd4   : > { %p3133_p3 = scmp.ne.s32.totalorder %s388_s19, %s3132_s17  ;;  %p3141_p7 = scmp.lt.s32.totalorder %s3132_s17, %s3132_s17 }
  0xd6   : > { %p3135_p9 = pnand %p3133_p3, %p4323_p0  ;;  %p3142_p11 = por %p3141_p7, %p3140_p5 }
  0xd8   : > { %p3136_p10 = pneg %p3135_p9 }
  0xda   : > { %p3143_p13 = pnand %p3142_p11, %p3136_p10 }
  0xdc   : > { %3146 = shalt.err (!%p3143_p13)
}
  0xdd   : > { %2725 = dma.hbm_to_vmem [thread:$0]  (!%p4324_p6), %s4259_s9, 512, %s388_s19, [#allocation20], %s4326_s11, %s4326_s11, %s4325_s10  }
  0xde   : > { %s3752_s22 = scalar_lea.hbm %s4250_s0, %s3593_s25  ;;  %s405_s26 = scalar_lea.vmem [#allocation4], %s3597_s4 }
  0xdf   : > { %s413_s16 = sshll.u32 %s405_s26, 4  ;;  %s3761_s5 = scalar_lea.hbm %s4252_s2, %s3593_s25  ;;  %s3755_s16 = int_to_ptr.vmem [resolvable:$true] %s413_s16 }
  0xe0   : > { %s4327_s1 = sand.u32 1, %s3354_s18   ;;  %s3147_s11 = scalar_lea.hbm %s3752_s22, 32 }
  0xe1   : > { %s402_s10 = scalar_lea.sflag [#allocation5], %s4327_s1  ;;  %p3148_p0 = scmp.ne.s32.totalorder %s3752_s22, %s3147_s11 }
  0xe2   : > { %p4328_p6 = scmp.ne.s32.totalorder %s4319_s7, 0  ;;  %s3152_s12 = scalar_lea.hbm %s4250_s0, 224 }
  0xe3   : > { %p3153_p8 = scmp.lt.u32.totalorder %s3752_s22, %s4250_s0  ;;  %p3154_p12 = scmp.lt.u32.totalorder %s3152_s12, %s3147_s11 }
  0xe4   : > { %p3150_p2 = pnand %p3148_p0, %p4328_p6  ;;  %p3156_p3 = scmp.lt.u32.totalorder %s3147_s11, %s3752_s22 }
  0xe5   : > { %p3155_p4 = por %p3154_p12, %p3153_p8 }
  0xe6   : > { %p3151_p1 = pneg %p3150_p2 }
  0xe7   : > { %p3157_p9 = por %p3156_p3, %p3155_p4 }
  0xe9   : > { %p3158_p10 = pnand %p3157_p9, %p3151_p1 }
  0xeb   : > { %3161 = shalt.err (!%p3158_p10)
}
  0xec   : > { %s3162_s20 = scalar_lea.vmem %s3755_s16, 32  ;;  %s3377_s24 = smov [#allocation4]  }
  0xed   : > { %p3163_p5 = scmp.ne.s32.totalorder %s3755_s16, %s3162_s20  ;;  %s3167_s3 = sshll.u32 %s3377_s24, 4  ;;  %s3168_s3 = int_to_ptr.vmem [resolvable:$false] %s3167_s3 }
  0xee   : > { %s3169_s26 = scalar_lea.vmem %s3168_s3, 64  ;;  %p3170_p13 = scmp.lt.s32.totalorder %s3755_s16, %s3168_s3 }
  0xef   : > { %p3165_p7 = pnand %p3163_p5, %p4328_p6  ;;  %p3171_p0 = scmp.lt.s32.totalorder %s3169_s26, %s3162_s20 }
  0xf1   : > { %p3166_p11 = pneg %p3165_p7  ;;  %p3172_p2 = por %p3171_p0, %p3170_p13 }
  0xf3   : > { %p3173_p8 = pnand %p3172_p2, %p3166_p11 }
  0xf5   : > { %3176 = shalt.err (!%p3173_p8)
}
  0xf6   : > { %p4329_p1 = scmp.ne.s32.totalorder %s4317_s13, 0  ;;  %s443_s28 = scalar_lea.vmem [#allocation9], %s3597_s4 }
  0xf7   : > { %s451_s29 = sshll.u32 %s443_s28, 4  ;;  %s3177_s1 = scalar_lea.hbm %s3761_s5, 32  ;;  %s452_s29 = int_to_ptr.vmem [resolvable:$true] %s451_s29 }
  0xf8   : > { %2729 = dma.hbm_to_vmem [thread:$0]  (!%p4329_p1), %s3752_s22, 32, %s3755_s16, %s402_s10  }
  0xf9   : > { %p3178_p12 = scmp.ne.s32.totalorder %s3761_s5, %s3177_s1  ;;  %s3182_s14 = scalar_lea.hbm %s4252_s2, 224 }
  0xfa   : > { %p3183_p9 = scmp.lt.u32.totalorder %s3761_s5, %s4252_s2  ;;  %p3184_p10 = scmp.lt.u32.totalorder %s3182_s14, %s3177_s1 }
  0xfb   : > { %p3180_p4 = pnand %p3178_p12, %p4328_p6  ;;  %p3186_p7 = scmp.lt.u32.totalorder %s3177_s1, %s3761_s5 }
  0xfc   : > { %p3185_p5 = por %p3184_p10, %p3183_p9 }
  0xfd   : > { %p3181_p3 = pneg %p3180_p4 }
  0xfe   : > { %p3187_p11 = por %p3186_p7, %p3185_p5 }
 0x100   : > { %p3188_p13 = pnand %p3187_p11, %p3181_p3 }
 0x102   : > { %3191 = shalt.err (!%p3188_p13)
}
 0x103   : > { %s3192_s4 = scalar_lea.vmem %s452_s29, 32  ;;  %s3378_s22 = smov [#allocation9]  }
 0x104   : > { %p3193_p0 = scmp.ne.s32.totalorder %s452_s29, %s3192_s4  ;;  %s3197_s16 = sshll.u32 %s3378_s22, 4  ;;  %s3198_s16 = int_to_ptr.vmem [resolvable:$false] %s3197_s16 }
 0x105   : > { %s3199_s10 = scalar_lea.vmem %s3198_s16, 64  ;;  %p3200_p12 = scmp.lt.s32.totalorder %s452_s29, %s3198_s16 }
 0x106   : > { %p3195_p2 = pnand %p3193_p0, %p4328_p6  ;;  %p3201_p4 = scmp.lt.s32.totalorder %s3199_s10, %s3192_s4 }
 0x108   : > { %p3196_p8 = pneg %p3195_p2  ;;  %p3202_p1 = por %p3201_p4, %p3200_p12 }
 0x10a   : > { %p3203_p9 = pnand %p3202_p1, %p3196_p8 }
 0x10c   : > { %3206 = shalt.err (!%p3203_p9)
}
 0x10d   : > { %p4330_p10 = scmp.ne.s32.totalorder %s4317_s13, 0  ;;  %s4331_s23 = sld [smem:[#allocation31_spill]] }
 0x10e   : > { %s4332_s7 = sld [smem:[#allocation30_spill]]  ;;  %s4333_s20 = sld [smem:[#allocation35_spill]] }
 0x10f   : > { %2735 = dma.hbm_to_vmem [thread:$0]  (!%p4330_p10), %s3761_s5, 32, %s452_s29, %s3617_s30  }
 0x110   : > { %s168_s24 = sadd.s32 1, %s3342_s15  ;;  %p4334_p1 = scmp.eq.s32.totalorder %s3584_s27, 0 }
 0x111   : > { %p4335_p3 = scmp.eq.s32.totalorder %s3366_s21, 0  ;;  %s479_s13 = sand.u32 1, %s3342_s15  }
 0x112   : > { %s3811_s3 = scalar_select %p4334_p1, %s3342_s15, %s168_s24  }
 0x113   : > { %p175_p6 = scmp.ne.s32.totalorder %s3342_s15, %s4331_s23  ;;  %s4336_s1 = sld [smem:[#allocation43_spill]] }
 0x114   : > { %p181_p7 = scmp.ne.s32.totalorder %s4331_s23, %s4332_s7  ;;  %p4337_p11 = scmp.eq.s32.totalorder %s4333_s20, 0 }
 0x115   : > { %p177_p5 = por %p175_p6, %p4335_p3  ;;  %s2509_s14 = sshll.u32 %s479_s13, 1 }
 0x116   : > { %p3824_p13 = por %p181_p7, %p4337_p11  ;;  %s481_s27 = scalar_lea.vmem [#allocation12], %s2509_s14 }
 0x117   : > { %s490_s5 = sshll.u32 %s481_s27, 4  ;;  %p4339_p0 = scmp.lt.s32.totalorder %s3366_s21, 7  ;;  %s491_s5 = int_to_ptr.vmem [resolvable:$true] %s490_s5 }
 0x118   : > { %s4338_s19 = scalar_select %p3824_p13, 1, 0 }
 0x119   : > { %s2348_s11 = scalar_lea.hbm %s4336_s1, %s3593_s25  ;;  %p3832_p2 = pnand %p4339_p0, %p177_p5 }
 0x11a   : > { %s3828_s30 = scalar_lea.hbm %s2348_s11, 32  ;;  %s3237_s25 = scalar_lea.hbm %s2348_s11, 64 }
 0x11b   : > { %p3208_p8 = scmp.ne.s32.totalorder %s3828_s30, %s3237_s25  ;;  %p3209_p12 = pneg %p3832_p2 }
 0x11c   : > { %s3212_s4 = scalar_lea.hbm %s4336_s1, 256  ;;  %p3213_p10 = scmp.lt.u32.totalorder %s3828_s30, %s4336_s1 }
 0x11d   : > { %p3210_p4 = pnand %p3209_p12, %p3208_p8  ;;  %p3214_p6 = scmp.lt.u32.totalorder %s3212_s4, %s3237_s25 }
 0x11e   : > { %p3216_p3 = scmp.lt.u32.totalorder %s3237_s25, %s3828_s30 }
 0x11f   : > { %p3211_p9 = pneg %p3210_p4  ;;  %p3215_p1 = por %p3214_p6, %p3213_p10 }
 0x121   : > { %p3217_p5 = por %p3216_p3, %p3215_p1 }
 0x123   : > { %p3218_p7 = pnand %p3217_p5, %p3211_p9 }
 0x125   : > { %3221 = shalt.err (!%p3218_p7)
}
 0x126   : > { %s3222_s10 = scalar_lea.vmem %s491_s5, 32  ;;  %s3379_s23 = smov [#allocation12]  }
 0x127   : > { %p3223_p11 = scmp.ne.s32.totalorder %s491_s5, %s3222_s10  ;;  %s3227_s7 = sshll.u32 %s3379_s23, 4  ;;  %s3228_s7 = int_to_ptr.vmem [resolvable:$false] %s3227_s7 }
 0x128   : > { %s3229_s20 = scalar_lea.vmem %s3228_s7, 64  ;;  %p3230_p4 = scmp.lt.s32.totalorder %s491_s5, %s3228_s7 }
 0x129   : > { %p3225_p0 = pnand %p3223_p11, %p3209_p12  ;;  %p3231_p13 = scmp.lt.s32.totalorder %s3229_s20, %s3222_s10 }
 0x12b   : > { %p3226_p8 = pneg %p3225_p0  ;;  %p3232_p6 = por %p3231_p13, %p3230_p4 }
 0x12d   : > { %p3233_p10 = pnand %p3232_p6, %p3226_p8 }
 0x12f   : > { %3236 = shalt.err (!%p3233_p10)
}
 0x130   : > { %s4341_s24 = sld [smem:[#allocation40_spill]]  ;;  %s4342_s13 = sld [smem:[#allocation36_spill]] }
 0x136   : > { %2741 = dma.hbm_to_vmem [thread:$0]  (!%p3832_p2), %s3828_s30, 32, %s491_s5, %s4341_s24  }
 0x137   : > { %p4343_p9 = scmp.ne.s32.totalorder %s4342_s13, 0 }
 0x138   : > { %s4344_s26 = sld [smem:[#allocation32_spill]] (!%p4343_p9) }
 0x139   : > { %499 = sbr.rel (%p4343_p9) target bundleno = 2042 (0x7fa), region = 60  ;;  %s4345_s28 = sld [smem:[#allocation38_spill]] (!%p4343_p9) }
 0x13e   : > { %s501_s11 = sand.u32 (!%p4343_p9), 1, %s4344_s26  }
 0x13f   : > { %s3860_s14 = sshll.u32 (!%p4343_p9), %s501_s11, 1  ;;  %s502_s27 = scalar_lea.sflag (!%p4343_p9), [#allocation5], %s501_s11 }
 0x140   : > { %s505_s25 = scalar_lea.vmem [#allocation4], %s3860_s14  ;;  %p4346_p12 = scmp.ne.s32.totalorder %s4345_s28, 0 }
 0x142   : > { %3301 = dma.done.wait (%p4346_p12), %s502_s27, 32  }
 0x143   : > { %3303 = vsyncadd (%p4346_p12), %s502_s27, 4294967264  ;;  %s4347_s29 = sld [smem:[#allocation35_spill]]  ;;  %s514_s12 = scalar_lea.vmem [#allocation7], %s3860_s14 }
 0x149   : > { %s510_s30 = sand.u32 1, %s4347_s29  }
 0x14a   : > { %s511_s5 = scalar_lea.sflag [#allocation8], %s510_s30 }
 0x14b   : > { %3305 = dma.done.wait (%p4346_p12), %s511_s5, 64  }
 0x14c   : > { %3307 = vsyncadd (%p4346_p12), %s511_s5, 4294967232  ;;  %s523_s17 = scalar_lea.vmem [#allocation9], %s3860_s14  ;;  %s529_s4 = scalar_lea.sflag [#allocation11], %s510_s30 }
 0x14d   : > { %s532_s22 = scalar_lea.vmem [#allocation10], %s3860_s14 }
 0x14e   : > { %3309 = dma.done.wait (%p4346_p12), %s529_s4, 32  }
 0x14f   : > { %3311 = vsyncadd (%p4346_p12), %s529_s4, 4294967264  ;;  %s4348_s16 = sld [smem:[#allocation31_spill]]  ;;  %p4349_p13 = scmp.ne.s32.totalorder %s4338_s19, 0 }
 0x155   : > { %s539_s10 = sand.u32 1, %s4348_s16  }
 0x156   : > { %s3880_s23 = sshll.u32 %s539_s10, 1 }
 0x157   : > { %s541_s7 = scalar_lea.vmem [#allocation12], %s3880_s23 }
 0x158   : > { %3313 = dma.done.wait (%p4349_p13), %s529_s4, 32  }
 0x159   : > { %3315 = vsyncadd (%p4349_p13), %s529_s4, 4294967264  ;;  %p4350_p2 = scmp.eq.s32.totalorder %s4347_s29, 0 }
 0x15b   : > { %3317 = dma.done.wait (%p4350_p2), [#allocation14], 768   ;;  %p4351_p1 = pmov %p4350_p2 }
 0x15d   : > { %3319 = vsyncadd (%p4351_p1), [#allocation14], 4294966528  ;;  %p4352_p3 = pmov %p4351_p1 }
 0x15e   : > { %p4353_p5 = pmov %p4351_p1 }
 0x15f   : > { %3321 = dma.done.wait (%p4352_p3), [#allocation17], 1024  }
 0x160   : > { %3323 = vsyncadd (%p4353_p5), [#allocation17], 4294966272  ;;  %p4354_p7 = pmov %p4351_p1 }
 0x161   : > { %p4355_p11 = pmov %p4351_p1 }
 0x162   : > { %3325 = dma.done.wait (%p4354_p7), [#allocation20], 512  }
 0x163   : > { %3327 = vsyncadd (%p4355_p11), [#allocation20], 4294966784  ;;  %v614_v0 = vld [vmem:[%s532_s22] sm:$0x3]  ;;  %s4356_s19 = sld [smem:[#allocation33_spill]] }
 0x169   : > { %p2522_p0 = scmp.ne.s32.totalorder %s4356_s19, 0 }
 0x16a   : > { %v619_v1 = vld [vmem:[#allocation13] sm:$0xff] (!%p2522_p0)  ;;  %v620_v2 = vld [vmem:[#allocation13 + $0x8] sm:$0x7] (!%p2522_p0)  ;;  %vm621_vm0 = vcmask (!%p2522_p0), 261120   ;;  %vm623_vm1 = vcmask (!%p2522_p0), 256000   ;;  %v3380_v3 = vmov (!%p2522_p0), 0.0|0.0  }
 0x16b   : > { %618 = sbr.rel (%p2522_p0) target bundleno = 582 (0x246), region = 104  ;;  %2648 = vmatprep.subr.bf16.mxu0 (!%p2522_p0), %v3380_v3  ;;  %622 = vst.msk [vmem:[#allocation2] sm:$0xff] (!%p2522_p0), %vm621_vm0, %v619_v1  ;;  %625 = vst.msk [vmem:[#allocation2 + $0x10] sm:$0xff] (!%p2522_p0), %vm621_vm0, %v619_v1  ;;  %vm631_vm2 = vcmask (!%p2522_p0), 1042432   ;;  %v2649_v4 = vpack.c.bf16 (!%p2522_p0), %v620_v2, %v619_v1  ;;  %vm3381_vm3 = vmmov (!%p2522_p0), 1   ;;  %vm3382_vm5 = vmmov (!%p2522_p0), 0  }
 0x16c   : > { %624 = vst.msk [vmem:[#allocation2 + $0x8] sm:$0x7] (!%p2522_p0), %vm623_vm1, %v620_v2  ;;  %626 = vst.msk [vmem:[#allocation2 + $0x18] sm:$0x7] (!%p2522_p0), %vm623_vm1, %v620_v2  ;;  %v3383_v5 = vmov (!%p2522_p0), 0.0   ;;  %vm627_vm6 = vcmask (!%p2522_p0), 89088  }
 0x16d   : > { %vm2650_vm4 = vmpackc.low (!%p2522_p0), %vm631_vm2, %vm3381_vm3  ;;  %2595 = vmatprep.mubr.msk.f32.mxu0 (!%p2522_p0), %vm3382_vm5, %v3383_v5  ;;  %vm705_vm7 = vcmask (!%p2522_p0), 254976  }
 0x16e   : > { %2651 = vmatpush3.bf16.msk.msra.mxu0 (!%p2522_p0), %vm2650_vm4, %v2649_v4 }
 0x171   : > { %2596 = vmatmul.mubr.msk.f32.vlgmr.msra.gmra.mrb[0].mxu0 (!%p2522_p0), %vm627_vm6, %v614_v0 }
 0x244   : > { %v701_v6 = vpop.f32.mrb[0].mxu0 }
 0x245   : > { %706 = vst.msk [vmem:[#allocation3] sm:$0x3] %vm705_vm7, %v701_v6  ;;  %v2597_v7 = vpop.f32.mrb[1].mxu0 }
 0x246 PF: > { %v709_v8 = vld [vmem:[#allocation15] sm:$0xff]  ;;  %v710_v9 = vld [vmem:[#allocation15 + $0x8] sm:$0xff]  ;;  %v711_v10 = vld [vmem:[#allocation15 + $0x10] sm:$0xff]  ;;  %v3384_v11 = vmov 0.0|0.0   ;;  %vm3385_vm8 = vmmov 0   ;;  %v3386_v14 = vmov 0.0   ;;  %v898_v17 = vlaneseq }
 0x247   : > { %2652 = vmatprep.subr.bf16.mxu0 %v3384_v11  ;;  %v2653_v12 = vpack.c.bf16 %v710_v9, %v709_v8  ;;  %v712_v13 = vld [vmem:[#allocation15 + $0x18] sm:$0xff]  ;;  %2606 = vmatprep.mubr.msk.f32.mxu0 %vm3385_vm8, %v3386_v14  ;;  %vm713_vm9 = vcmask 261120   ;;  %v814_v31 = vld [vmem:[#allocation18] sm:$0xff]  ;;  %v815_v32 = vld [vmem:[#allocation18 + $0x8] sm:$0xff]  ;;  %s3387_s20 = smov 32   ;;  %s3389_s24 = smov 96  }
 0x248   : > { %2658 = vmatprep.subr.bf16.mxu1 %v3384_v11  ;;  %2617 = vmatprep.mubr.msk.f32.mxu1 %vm3385_vm8, %v3386_v14  ;;  %v2656_v15 = vpack.c.bf16 %v712_v13, %v711_v10  ;;  %v3912_v18 = vshrl.u32 %v898_v17, 7  ;;  %v708_v23 = vld [vmem:[%s505_s25] sm:$0x3]  ;;  %v816_v33 = vld [vmem:[#allocation18 + $0x10] sm:$0xff]  ;;  %v2659_v34 = vpack.c.bf16 %v815_v32, %v814_v31  ;;  %v3388_v40 = vmov 1966171168  }
 0x249   : > { %2654 = vmatpush3.bf16.msra.mxu0 %v2653_v12  ;;  %v817_v35 = vld [vmem:[#allocation18 + $0x18] sm:$0xff]  ;;  %v896_v41 = vunpack.c.l.s4 %v3388_v40  ;;  %v810_v46 = vld [vmem:[#allocation16] sm:$0xff]  ;;  %v811_v47 = vld [vmem:[#allocation16 + $0x8] sm:$0xff]  ;;  %vm2154_vm10 = vcmask 523520   ;;  %vm2156_vm11 = vcmask 518400   ;;  %vm2176_vm12 = vcmask 1041409  }
 0x24a   : > { %2655 = vmatprep.subr.bf16.mxu0 %v3384_v11  ;;  %v3915_v19 = vsub.s32 0, %v3912_v18  ;;  %v1835_v21 = vsub.s32 1, %v3912_v18  ;;  %2660 = vmatpush3.bf16.msra.mxu1 %v2659_v34  ;;  %v2662_v37 = vpack.c.bf16 %v817_v35, %v816_v33  ;;  %v806_v45 = vld [vmem:[#allocation2] sm:$0xff]  ;;  %v812_v48 = vld [vmem:[#allocation16 + $0x10] sm:$0xff]  ;;  %v2665_v51 = vpack.c.bf16 %v811_v47, %v810_v46  ;;  %s4357_s13 = sld [smem:[#allocation35_spill]]  ;;  %s4358_s26 = sld [smem:[#allocation33_spill]] }
 0x24b   : > { %2661 = vmatprep.subr.bf16.mxu1 %v3384_v11  ;;  %v897_v43 = vunpack.c.0.s8 %v896_v41  ;;  %v929_v49 = vcombine.high %v806_v45, %v806_v45  ;;  %v813_v52 = vld [vmem:[#allocation16 + $0x18] sm:$0xff]  ;;  %v2529_v53 = vld.sshfl [vmem:[#allocation2 + $0x8] sm:$0x13 pattern:$0x75316420]  ;;  %v808_v54 = vld [vmem:[#allocation2 + $0x10] sm:$0xff] }
 0x24c   : > { %v707_v16 = vld [vmem:[#allocation3] sm:$0x3]  ;;  %v1825_v20 = vrot.slane %v614_v0, %v3915_v19  ;;  %v3921_v22 = vrot.slane %v614_v0, %v1835_v21  ;;  %v2668_v55 = vpack.c.bf16 %v813_v52, %v812_v48  ;;  %v985_v59 = vcombine.high %v2529_v53, %v2529_v53  ;;  %v2530_v34 = vld.sshfl [vmem:[#allocation2 + $0x18] sm:$0x13 pattern:$0x75316420] }
 0x24d   : > { %2657 = vmatpush3.bf16.msra.mxu0 %v2656_v15  ;;  %v3930_v44 = vsub.s32 %v897_v43, %v3912_v18  ;;  %v1001_v61 = vcombine.high %v808_v54, %v808_v54  ;;  %v1057_v43 = vcombine.high %v2530_v34, %v2530_v34  ;;  %vm2181_vm13 = vcmask 254976   ;;  %s3390_s28 = smov [#allocation21]  }
 0x24e   : > { %2664 = vmatprep.subr.bf16.mxu0 %v3384_v11  ;;  %1827 = vbcast.lane.b32.xlu1 %v1825_v20, 256  ;;  %vm2123_vm14 = vcmask 256000   ;;  %s2291_s11 = sshll.u32 %s3390_s28, 4  ;;  %vm2280_vm15 = vcmask 8192   ;;  %s2292_s11 = int_to_ptr.vmem [resolvable:$true] %s2291_s11 }
 0x24f   : > { %2663 = vmatpush3.bf16.msra.mxu1 %v2662_v37  ;;  %v936_v50 = vrot.slane %v806_v45, %v3930_v44  ;;  %v943_v56 = vrot.slane %v929_v49, %v3930_v44  ;;  %v3938_v60 = vrot.slane %v2529_v53, %v3930_v44  ;;  %v1008_v62 = vrot.slane %v808_v54, %v3930_v44  ;;  %s3238_s27 = scalar_lea.vmem %s2292_s11, 128  ;;  %p3245_p9 = scmp.lt.s32.totalorder %s2292_s11, %s2292_s11 }
 0x250   : > { %2607 = vmatmul.mubr.msk.f32.vlgmr.msra.gmra.mrb[0].mxu0 %vm713_vm9, %v707_v16  ;;  %2670 = vmatprep.subr.bf16.mxu1 %v3384_v11  ;;  %v3949_v2 = vrot.slane %v985_v59, %v3930_v44  ;;  %v1015_v4 = vrot.slane %v1001_v61, %v3930_v44  ;;  %v4020_v52 = vrot.slane %v2530_v34, %v3930_v44  ;;  %p2753_p8 = scmp.eq.s32.totalorder %s4357_s13, 6  ;;  %s2279_s14 = scalar_lea.vmem [#allocation21], %s4358_s26 }
 0x251   : > { %2628 = vmatprep.mubr.msk.f32.mxu0 %vm3385_vm8, %v3386_v14  ;;  %v944_v57 = vcombine.high %v936_v50, %v936_v50  ;;  %v3935_v58 = vrot.slane %v936_v50, %v3930_v44  ;;  %2666 = vmatpush3.bf16.msra.mxu0 %v2665_v51  ;;  %v945_v63 = vcombine.high %v943_v56, %v943_v56  ;;  %p3239_p4 = scmp.ne.s32.totalorder %s2292_s11, %s3238_s27  ;;  %p3246_p12 = scmp.lt.s32.totalorder %s3238_s27, %s3238_s27 }
 0x252   : > { %1831 = vbcast.lane.b32.xlu1 %v1825_v20, 264  ;;  %2667 = vmatprep.subr.bf16.mxu0 %v3384_v11  ;;  %v3943_v0 = vrot.slane %v943_v56, %v3930_v44  ;;  %v3953_v3 = vcombine.high %v3938_v60, %v3938_v60  ;;  %v1016_v5 = vcombine.high %v1008_v62, %v1008_v62 }
 0x253   : > { %v3946_v1 = vrot.slane %v944_v57, %v3930_v44  ;;  %v3957_v8 = vrot.slane %v945_v63, %v3930_v44  ;;  %v3964_v12 = vrot.slane %v1008_v62, %v3930_v44  ;;  %v3969_v15 = vrot.slane %v1015_v4, %v3930_v44  ;;  %p3240_p6 = pnand %p3239_p4, %p2753_p8  ;;  %p3247_p13 = por %p3246_p12, %p3245_p9 }
 0x254   : > { %v3972_v16 = vrot.slane %v1016_v5, %v3930_v44  ;;  %v1220_v20 = vcombine.low %v3938_v60, %v3949_v2  ;;  %v1017_v40 = vcombine.high %v1015_v4, %v1015_v4  ;;  %v4024_v54 = vrot.slane %v1057_v43, %v3930_v44 }
 0x255   : > { %v1171_v9 = vcombine.low %v3935_v58, %v3946_v1  ;;  %v2531_v10 = vcombine.high %v3935_v58, %v3946_v1  ;;  %2669 = vmatpush3.bf16.msra.mxu0 %v2668_v55  ;;  %v4012_v48 = vcombine.high %v3969_v15, %v3969_v15  ;;  %v4031_v56 = vcombine.high %v4020_v52, %v4020_v52  ;;  %p3241_p10 = pneg %p3240_p6 }
 0x256   : > { %1842 = vbcast.lane.b32.xlu1 %v3921_v22, 264  ;;  %v1230_v33 = vrot.slane %v1220_v20, %v3930_v44  ;;  %v4008_v47 = vrot.slane %v1017_v40, %v3930_v44 }
 0x257   : > { %v1271_v62 = vcombine.low %v4024_v54, %v4031_v56  ;;  %p3248_p2 = pnand %p3247_p13, %p3241_p10 }
 0x258   : > { %v1269_v55 = vcombine.low %v4008_v47, %v4012_v48 }
 0x259   : > { %v1292_v4 = vrot.slane %v1271_v62, %v3930_v44 }
 0x25a   : > { %v1278_v61 = vrot.slane %v1269_v55, %v3930_v44 }
 0x323   : > { %v783_v24 = vpop.f32.mrb[0].mxu0 }
 0x324   : > { %v787_v25 = vadd.f32 %v783_v24, %v708_v23  ;;  %v2608_v26 = vpop.f32.mrb[1].mxu0  ;;  %v1173_v23 = vcombine.low %v3943_v0, %v3957_v8  ;;  %v2532_v24 = vcombine.high %v3943_v0, %v3957_v8 }
 0x325   : > { %v1188_v26 = vrot.slane %v2531_v10, %v3930_v44 }
 0x326   : > { %v2527_v27 = vmul.f32 -2.0, %v787_v25  ;;  %v2526_v38 = vmul.f32 -1.442695, %v787_v25  ;;  %v1181_v25 = vrot.slane %v1171_v9, %v3930_v44  ;;  %v1202_v31 = vrot.slane %v2532_v24, %v3930_v44 }
 0x328   : > { %v796_v28 = vmul.f32 1.442695, %v2527_v27  ;;  %v3986_v27 = vcombine.high %v3964_v12, %v3964_v12  ;;  %v1203_v32 = vcombine.low %v1181_v25, %v1188_v26 }
 0x32a   : > { %2847 = vpow2.f32 %v796_v28  ;;  %v3990_v28 = vcombine.high %v3972_v16, %v3972_v16  ;;  %v1222_v35 = vcombine.low %v3972_v16, %v3986_v27 }
 0x32c   : > { %v1244_v41 = vrot.slane %v1222_v35, %v3930_v44 }
 0x334   : > { %v2848_v29 = vpop.eup %2847 }
 0x335   : > { %v798_v30 = vadd.f32 1.0, %v2848_v29  ;;  %v1221_v29 = vcombine.low %v3953_v3, %v3964_v12 }
 0x337   : > { %2849 = vrcp.f32 %v798_v30  ;;  %v1195_v30 = vrot.slane %v1173_v23, %v3930_v44 }
 0x338   : > { %2851 = vpow2.f32 %v2526_v38  ;;  %v1211_v38 = vrot.slane %v1203_v32, %v3930_v44  ;;  %v818_v32 = vld [vmem:[%s514_s12] sm:$0x3] }
 0x339   : > { %v1204_v37 = vcombine.low %v1195_v30, %v1202_v31  ;;  %v4059_v30 = vld [vmem:[%s541_s7] sm:$0x3] }
 0x33a   : > { %v2131_v31 = vrot.slane %v4059_v30, %v3915_v19 }
 0x33b   : > { %v1218_v45 = vrot.slane %v1204_v37, %v3930_v44 }
 0x33c   : > { %2137 = vbcast.lane.b32.xlu1 %v2131_v31, 264 }
 0x33d   : > { %v1219_v50 = vcombine.low %v1211_v38, %v1218_v45 }
 0x33f   : > { %2629 = vmatmul.mubr.msk.f32.vlgmr.msra.gmra.mrb[2].mxu0 %vm713_vm9, %v1219_v50 }
 0x340   : > { %2631 = vmatprep.mubr.msk.f32.mxu0 %vm3385_vm8, %v3386_v14 }
 0x341   : > { %v2850_v36 = vpop.eup %2849 }
 0x342   : > { %802 = vrot.lane.b32.xlu0 %v2850_v36, %s3387_s20  ;;  %v2852_v39 = vpop.eup %2851  ;;  %v1223_v36 = vcombine.low %v3990_v28, %v3969_v15 }
 0x343   : > { %v791_v42 = vadd.f32 1.0, %v2852_v39  ;;  %v1237_v39 = vrot.slane %v1221_v29, %v3930_v44 }
 0x345   : > { %2853 = vrcp.f32 %v791_v42  ;;  %v1251_v42 = vrot.slane %v1223_v36, %v3930_v44  ;;  %v1252_v46 = vcombine.low %v1230_v33, %v1237_v39 }
 0x347   : > { %v1253_v49 = vcombine.low %v1244_v41, %v1251_v42  ;;  %v1260_v51 = vrot.slane %v1252_v46, %v3930_v44 }
 0x349   : > { %v1267_v53 = vrot.slane %v1253_v49, %v3930_v44 }
 0x34b   : > { %v1268_v59 = vcombine.low %v1260_v51, %v1267_v53 }
 0x34d   : > { %2632 = vmatmul.mubr.msk.f32.gmra.mrb[4].mxu0 %vm713_vm9, %v1268_v59 }
 0x34e   : > { %2634 = vmatprep.mubr.msk.f32.mxu0 %vm3385_vm8, %v3386_v14 }
 0x34f   : > { %v2854_v6 = vpop.eup %2853 }
 0x3b4   : > { %v803_v7 = vpop.permute.xlu0 %802 }
 0x3b5   : > { %v3966_v13 = vmul.f32 %v2854_v6, %v803_v7  ;;  %v1307_v7 = vrot.slane %v1292_v4, %v3930_v44 }
 0x3b7   : > { %820 = vrot.lane.b32.xlu0 %v3966_v13, %s3389_s24 }
 0x3bb   : > { %1838 = vbcast.lane.b32.xlu0 %v3921_v22, 256  ;;  %v4017_v22 = vcombine.high %v4008_v47, %v4008_v47 }
 0x3bd   : > { %v1270_v57 = vcombine.low %v4017_v22, %v4020_v52 }
 0x3bf   : > { %v1285_v63 = vrot.slane %v1270_v57, %v3930_v44  ;;  %2133 = vbcast.lane.b32.xlu0 %v2131_v31, 256 }
 0x3c1   : > { %v1293_v5 = vcombine.low %v1278_v61, %v1285_v63 }
 0x3c3   : > { %v1300_v6 = vrot.slane %v1293_v5, %v3930_v44 }
 0x3c5   : > { %v1308_v9 = vcombine.low %v1300_v6, %v1307_v7 }
 0x3c7   : > { %2635 = vmatmul.mubr.msk.f32.gmra.mrb[6].mxu0 %vm713_vm9, %v1308_v9 }
 0x412   : > { %v4051_v20 = vpop.f32.mrb[2].mxu0 }
 0x413   : > { %v2630_v23 = vpop.f32.mrb[3].mxu0 }
 0x420   : > { %v4053_v24 = vpop.f32.mrb[4].mxu0 }
 0x421   : > { %v2633_v25 = vpop.f32.mrb[5].mxu0 }
 0x429   : > { %v821_v10 = vpop.permute.xlu0 %820 }
 0x42a   : > { %2618 = vmatmul.mubr.msk.f32.vlgmr.msra.gmra.mrb[0].mxu1 %vm713_vm9, %v821_v10 }
 0x42b   : > { %2645 = vmatprep.mubr.msk.f32.mxu1 %vm3385_vm8, %v3386_v14 }
 0x49a   : > { %v4055_v26 = vpop.f32.mrb[6].mxu0 }
 0x49b   : > { %v2636_v29 = vpop.f32.mrb[7].mxu0 }
 0x4fd   : > { %v890_v14 = vpop.f32.mrb[0].mxu1 }
 0x4fe   : > { %v891_v33 = vadd.f32 %v890_v14, %v818_v32  ;;  %v2619_v34 = vpop.f32.mrb[1].mxu1 }
 0x500   : > { %v901_v35 = vrot.slane %v891_v33, %v3930_v44 }
 0x502   : > { %v902_v36 = vcombine.high %v901_v35, %v901_v35  ;;  %v909_v37 = vrot.slane %v901_v35, %v3930_v44 }
 0x504   : > { %v916_v38 = vrot.slane %v902_v36, %v3930_v44  ;;  %v920_v39 = vrot.slane %v909_v37, %v3915_v19 }
 0x506   : > { %v924_v40 = vrot.slane %v916_v38, %v3915_v19  ;;  %v1073_v41 = vcombine.high %v920_v39, %v920_v39  ;;  %v1080_v42 = vrot.slane %v920_v39, %v3930_v44 }
 0x508   : > { %v1087_v43 = vrot.slane %v1073_v41, %v3930_v44  ;;  %v1088_v45 = vcombine.high %v1080_v42, %v1080_v42  ;;  %v1096_v46 = vrot.slane %v1080_v42, %v3930_v44  ;;  %v1122_v49 = vcombine.high %v924_v40, %v924_v40 }
 0x509   : > { %v1129_v50 = vrot.slane %v924_v40, %v3930_v44 }
 0x50a   : > { %v1089_v51 = vcombine.high %v1087_v43, %v1087_v43  ;;  %v1136_v53 = vrot.slane %v1122_v49, %v3930_v44  ;;  %v1110_v55 = vrot.slane %v1088_v45, %v3930_v44  ;;  %v1103_v61 = vrot.slane %v1087_v43, %v3930_v44 }
 0x50b   : > { %v1137_v57 = vcombine.high %v1129_v50, %v1129_v50  ;;  %v1145_v59 = vrot.slane %v1129_v50, %v3930_v44  ;;  %v1118_v62 = vcombine.high %v1096_v46, %v1096_v46 }
 0x50c   : > { %v1117_v63 = vrot.slane %v1089_v51, %v3930_v44  ;;  %v1309_v4 = vcombine.low %v1096_v46, %v1110_v55  ;;  %v2533_v5 = vcombine.high %v1096_v46, %v1110_v55  ;;  %v1152_v6 = vrot.slane %v1136_v53, %v3930_v44 }
 0x50d   : > { %v1159_v7 = vrot.slane %v1137_v57, %v3930_v44  ;;  %v1167_v9 = vcombine.high %v1145_v59, %v1145_v59  ;;  %v1358_v10 = vcombine.low %v1118_v62, %v1145_v59  ;;  %v1138_v23 = vcombine.high %v1136_v53, %v1136_v53 }
 0x50e   : > { %v1311_v25 = vcombine.low %v1103_v61, %v1117_v63  ;;  %v2534_v29 = vcombine.high %v1103_v61, %v1117_v63  ;;  %v1319_v31 = vrot.slane %v1309_v4, %v3930_v44  ;;  %v1326_v32 = vrot.slane %v2533_v5, %v3930_v44 }
 0x50f   : > { %v1169_v14 = vcombine.high %v1159_v7, %v1159_v7  ;;  %v1359_v33 = vcombine.low %v1159_v7, %v1167_v9  ;;  %v1367_v34 = vrot.slane %v1358_v10, %v3930_v44  ;;  %v1166_v35 = vrot.slane %v1138_v23, %v3930_v44 }
 0x510   : > { %v1333_v36 = vrot.slane %v1311_v25, %v3930_v44  ;;  %v1340_v37 = vrot.slane %v2534_v29, %v3930_v44  ;;  %v1341_v38 = vcombine.low %v1319_v31, %v1326_v32  ;;  %v1168_v39 = vcombine.high %v1152_v6, %v1152_v6 }
 0x511   : > { %v1360_v40 = vcombine.low %v1169_v14, %v1152_v6  ;;  %v1170_v41 = vcombine.high %v1166_v35, %v1166_v35  ;;  %v1374_v45 = vrot.slane %v1359_v33, %v3930_v44  ;;  %v1382_v49 = vcombine.low %v1319_v31, %v1367_v34 }
 0x512   : > { %v1342_v42 = vcombine.low %v1333_v36, %v1340_v37  ;;  %v1399_v43 = vcombine.low %v1166_v35, %v1168_v39  ;;  %v1349_v51 = vrot.slane %v1341_v38, %v3930_v44 }
 0x513   : > { %v1381_v46 = vrot.slane %v1360_v40, %v3930_v44  ;;  %v1400_v50 = vcombine.low %v1170_v41, %v1145_v59  ;;  %v1390_v63 = vrot.slane %v1382_v49, %v3930_v44  ;;  %v1429_v9 = vrot.slane %v1374_v45, %v3930_v44 }
 0x514   : > { %v1356_v53 = vrot.slane %v1342_v42, %v3930_v44  ;;  %v1407_v57 = vrot.slane %v1399_v43, %v3930_v44 }
 0x515   : > { %v1383_v55 = vcombine.low %v1374_v45, %v1381_v46  ;;  %v1414_v61 = vrot.slane %v1400_v50, %v3930_v44 }
 0x516   : > { %v1357_v62 = vcombine.low %v1349_v51, %v1356_v53 }
 0x517   : > { %v1397_v4 = vrot.slane %v1383_v55, %v3930_v44  ;;  %v1415_v5 = vcombine.low %v1407_v57, %v1414_v61 }
 0x518   : > { %v1507_v6 = vadd.f32 %v4051_v20, %v1357_v62 }
 0x519   : > { %v1398_v7 = vcombine.low %v1390_v63, %v1397_v4  ;;  %v1422_v59 = vrot.slane %v1415_v5, %v3930_v44 }
 0x51a   : > { %v1523_v10 = vcombine.high %v1507_v6, %v1507_v6  ;;  %v1530_v23 = vrot.slane %v1507_v6, %v3930_v44 }
 0x51b   : > { %v1512_v25 = vadd.f32 %v4053_v24, %v1398_v7  ;;  %v1430_v29 = vcombine.low %v1422_v59, %v1429_v9 }
 0x51c   : > { %v1537_v31 = vrot.slane %v1523_v10, %v3930_v44  ;;  %v1538_v32 = vcombine.high %v1530_v23, %v1530_v23  ;;  %v1546_v14 = vrot.slane %v1530_v23, %v3930_v44 }
 0x51d   : > { %v1572_v33 = vcombine.high %v1512_v25, %v1512_v25  ;;  %v1579_v34 = vrot.slane %v1512_v25, %v3930_v44  ;;  %v4104_v20 = vadd.f32 %v4055_v26, %v1430_v29 }
 0x51e   : > { %v1539_v35 = vcombine.high %v1537_v31, %v1537_v31  ;;  %v1553_v36 = vrot.slane %v1537_v31, %v3930_v44  ;;  %v1560_v37 = vrot.slane %v1538_v32, %v3930_v44  ;;  %v1568_v38 = vcombine.high %v1546_v14, %v1546_v14 }
 0x51f   : > { %v2538_v39 = vmul.f32 -1.442695, %v1546_v14  ;;  %v1587_v24 = vcombine.high %v1579_v34, %v1579_v34  ;;  %v1595_v40 = vrot.slane %v1579_v34, %v3930_v44  ;;  %v1586_v26 = vrot.slane %v1572_v33, %v3930_v44 }
 0x520   : > { %v1567_v41 = vrot.slane %v1539_v35, %v3930_v44  ;;  %v1569_v42 = vcombine.high %v1553_v36, %v1553_v36  ;;  %v1570_v43 = vcombine.high %v1560_v37, %v1560_v37  ;;  %v2539_v45 = vmul.f32 -1.442695, %v1560_v37 }
 0x521   : > { %2855 = vpow2.f32 %v2538_v39  ;;  %v2540_v46 = vmul.f32 -1.442695, %v1568_v38  ;;  %v2542_v49 = vmul.f32 -1.442695, %v1553_v36  ;;  %v1609_v57 = vrot.slane %v1587_v24, %v3930_v44 }
 0x522   : > { %v1571_v50 = vcombine.high %v1567_v41, %v1567_v41  ;;  %2857 = vpow2.f32 %v2539_v45  ;;  %v2541_v51 = vmul.f32 -1.442695, %v1570_v43  ;;  %v2543_v53 = vmul.f32 -1.442695, %v1567_v41 }
 0x523   : > { %2859 = vpow2.f32 %v2540_v46  ;;  %v2544_v55 = vmul.f32 -1.442695, %v1569_v42  ;;  %v1617_v62 = vcombine.high %v1595_v40, %v1595_v40  ;;  %v1602_v63 = vrot.slane %v1586_v26, %v3930_v44 }
 0x524   : > { %2861 = vpow2.f32 %v2541_v51  ;;  %v2545_v61 = vmul.f32 -1.442695, %v1571_v50  ;;  %v1619_v4 = vcombine.high %v1609_v57, %v1609_v57  ;;  %v2546_v5 = vmul.f32 -1.442695, %v1595_v40 }
 0x525   : > { %2863 = vpow2.f32 %v2542_v49  ;;  %v2547_v6 = vmul.f32 -1.442695, %v1609_v57  ;;  %v2548_v7 = vmul.f32 -1.442695, %v1617_v62  ;;  %v1588_v59 = vcombine.high %v1586_v26, %v1586_v26 }
 0x526   : > { %2865 = vpow2.f32 %v2543_v53  ;;  %v2549_v9 = vmul.f32 -1.442695, %v1619_v4  ;;  %v2550_v10 = vmul.f32 -1.442695, %v1602_v63  ;;  %v1628_v33 = vrot.slane %v4104_v20, %v3930_v44 }
 0x527   : > { %2867 = vpow2.f32 %v2544_v55  ;;  %v1616_v31 = vrot.slane %v1588_v59, %v3930_v44  ;;  %v1618_v38 = vcombine.high %v1602_v63, %v1602_v63  ;;  %v1621_v41 = vcombine.high %v4104_v20, %v4104_v20 }
 0x528   : > { %2869 = vpow2.f32 %v2545_v61  ;;  %v1636_v45 = vcombine.high %v1628_v33, %v1628_v33  ;;  %v1644_v62 = vrot.slane %v1628_v33, %v3930_v44 }
 0x529   : > { %2871 = vpow2.f32 %v2546_v5  ;;  %v1620_v40 = vcombine.high %v1616_v31, %v1616_v31  ;;  %v2551_v26 = vmul.f32 -1.442695, %v1616_v31  ;;  %v2552_v53 = vmul.f32 -1.442695, %v1618_v38 }
 0x52a   : > { %2873 = vpow2.f32 %v2547_v6  ;;  %v1635_v61 = vrot.slane %v1621_v41, %v3930_v44  ;;  %v1658_v4 = vrot.slane %v1636_v45, %v3930_v44 }
 0x52b   : > { %v2856_v23 = vpop.eup %2855  ;;  %2875 = vpow2.f32 %v2548_v7  ;;  %v2553_v57 = vmul.f32 -1.442695, %v1620_v40 }
 0x52c   : > { %v2858_v25 = vpop.eup %2857  ;;  %v1756_v29 = vadd.f32 1.0, %v2856_v23  ;;  %2877 = vpow2.f32 %v2549_v9  ;;  %v974_v9 = vcombine.high %v3935_v58, %v3935_v58  ;;  %v1637_v23 = vcombine.high %v1635_v61, %v1635_v61 }
 0x52d   : > { %v2860_v32 = vpop.eup %2859  ;;  %v1757_v14 = vadd.f32 1.0, %v2858_v25  ;;  %2879 = vpow2.f32 %v2550_v10  ;;  %v1666_v25 = vcombine.high %v1644_v62, %v1644_v62  ;;  %v1667_v33 = vcombine.high %v1658_v4, %v1658_v4 }
 0x52e   : > { %v2862_v34 = vpop.eup %2861  ;;  %v1758_v35 = vadd.f32 1.0, %v2860_v32  ;;  %2881 = vrcp.f32 %v1756_v29  ;;  %v976_v29 = vcombine.high %v3946_v1, %v3946_v1 }
 0x52f   : > { %v2864_v36 = vpop.eup %2863  ;;  %v1759_v37 = vadd.f32 1.0, %v2862_v34  ;;  %2883 = vrcp.f32 %v1757_v14  ;;  %v1651_v14 = vrot.slane %v1635_v61, %v3930_v44 }
 0x530   : > { %v2866_v39 = vpop.eup %2865  ;;  %v1760_v24 = vadd.f32 1.0, %v2864_v36  ;;  %2885 = vrcp.f32 %v1758_v35  ;;  %v2554_v35 = vmul.f32 -1.442695, %v1644_v62  ;;  %v975_v36 = vcombine.high %v3943_v0, %v3943_v0 }
 0x531   : > { %v2868_v42 = vpop.eup %2867  ;;  %v1761_v43 = vadd.f32 1.0, %v2866_v39  ;;  %2887 = vrcp.f32 %v1759_v37  ;;  %v2555_v39 = vmul.f32 -1.442695, %v1658_v4 }
 0x532   : > { %v2870_v46 = vpop.eup %2869  ;;  %v1762_v49 = vadd.f32 1.0, %v2868_v42  ;;  %2889 = vrcp.f32 %v1760_v24  ;;  %v977_v24 = vcombine.high %v3957_v8, %v3957_v8  ;;  %v1665_v42 = vrot.slane %v1637_v23, %v3930_v44 }
 0x533   : > { %v2872_v50 = vpop.eup %2871  ;;  %v1763_v51 = vadd.f32 1.0, %v2870_v46  ;;  %2891 = vrcp.f32 %v1761_v43  ;;  %v2556_v43 = vmul.f32 -1.442695, %v1666_v25 }
 0x534   : > { %v2874_v55 = vpop.eup %2873  ;;  %2893 = vrcp.f32 %v1762_v49  ;;  %v1764_v63 = vadd.f32 1.0, %v2872_v50  ;;  %v2558_v50 = vmul.f32 -1.442695, %v1651_v14 }
 0x535   : > { %v2876_v20 = vpop.eup %2875  ;;  %2895 = vrcp.f32 %v1763_v51  ;;  %v1765_v6 = vadd.f32 1.0, %v2874_v55 }
 0x536   : > { %v2878_v5 = vpop.eup %2877  ;;  %2897 = vpow2.f32 %v2551_v26  ;;  %v1766_v59 = vadd.f32 1.0, %v2876_v20  ;;  %v2557_v26 = vmul.f32 -1.442695, %v1667_v33 }
 0x537   : > { %v2880_v7 = vpop.eup %2879  ;;  %2899 = vpow2.f32 %v2552_v53  ;;  %v1767_v32 = vadd.f32 1.0, %v2878_v5 }
 0x538   : > { %v2882_v10 = vpop.eup %2881  ;;  %2901 = vpow2.f32 %v2553_v57 }
 0x539   : > { %v2884_v31 = vpop.eup %2883  ;;  %2903 = vrcp.f32 %v1764_v63  ;;  %v1902_v40 = vmul.f32 %v2882_v10, %v3935_v58 }
 0x53a   : > { %v2886_v34 = vpop.eup %2885  ;;  %2905 = vrcp.f32 %v1765_v6  ;;  %v1903_v37 = vmul.f32 %v2884_v31, %v3946_v1  ;;  %v1768_v6 = vadd.f32 1.0, %v2880_v7 }
 0x53b   : > { %v2888_v38 = vpop.eup %2887  ;;  %2907 = vrcp.f32 %v1766_v59  ;;  %v1904_v45 = vmul.f32 %v2886_v34, %v974_v9  ;;  %v2559_v9 = vmul.f32 -1.442695, %v1665_v42 }
 0x53c   : > { %v2890_v41 = vpop.eup %2889  ;;  %v1905_v46 = vmul.f32 %v2888_v38, %v976_v29  ;;  %2909 = vrcp.f32 %v1767_v32  ;;  %v1946_v51 = vcombine.low %v1902_v40, %v1903_v37 }
 0x53d   : > { %v2892_v49 = vpop.eup %2891  ;;  %2911 = vpow2.f32 %v2554_v35  ;;  %v1906_v53 = vmul.f32 %v2890_v41, %v3943_v0 }
 0x53e   : > { %v2894_v1 = vpop.eup %2893  ;;  %v1907_v55 = vmul.f32 %v2892_v49, %v3957_v8  ;;  %v1947_v57 = vcombine.low %v1904_v45, %v1905_v46  ;;  %2913 = vpow2.f32 %v2555_v39  ;;  %v1956_v8 = vrot.slane %v1946_v51, %v3930_v44 }
 0x53f   : > { %v2896_v61 = vpop.eup %2895  ;;  %v1908_v58 = vmul.f32 %v2894_v1, %v975_v36  ;;  %2915 = vpow2.f32 %v2556_v43 }
 0x540   : > { %v2898_v62 = vpop.eup %2897  ;;  %v1909_v20 = vmul.f32 %v2896_v61, %v977_v24  ;;  %v1948_v63 = vcombine.low %v1906_v53, %v1907_v55  ;;  %v1963_v4 = vrot.slane %v1947_v57, %v3930_v44  ;;  %2917 = vpow2.f32 %v2557_v26 }
 0x541   : > { %v2900_v5 = vpop.eup %2899  ;;  %v1769_v59 = vadd.f32 1.0, %v2898_v62  ;;  %2919 = vpow2.f32 %v2558_v50 }
 0x542   : > { %v2902_v10 = vpop.eup %2901  ;;  %v1770_v23 = vadd.f32 1.0, %v2900_v5  ;;  %v1949_v0 = vcombine.low %v1908_v58, %v1909_v20  ;;  %v1970_v32 = vrot.slane %v1948_v63, %v3930_v44  ;;  %v1978_v33 = vcombine.low %v1956_v8, %v1963_v4 }
 0x543   : > { %v2904_v25 = vpop.eup %2903  ;;  %v1771_v29 = vadd.f32 1.0, %v2902_v10  ;;  %2921 = vrcp.f32 %v1769_v59 }
 0x544   : > { %v2906_v31 = vpop.eup %2905  ;;  %2923 = vrcp.f32 %v1770_v23  ;;  %v1977_v14 = vrot.slane %v1949_v0, %v3930_v44  ;;  %v1910_v34 = vmul.f32 %v2904_v25, %v3938_v60  ;;  %v1986_v40 = vrot.slane %v1978_v33, %v3930_v44 }
 0x545   : > { %v2908_v7 = vpop.eup %2907  ;;  %2925 = vrcp.f32 %v1768_v6  ;;  %v1911_v35 = vmul.f32 %v2906_v31, %v3949_v2 }
 0x546   : > { %2927 = vpow2.f32 %v2559_v9  ;;  %v1912_v36 = vmul.f32 %v2908_v7, %v3953_v3  ;;  %v1979_v37 = vcombine.low %v1970_v32, %v1977_v14  ;;  %v2910_v38 = vpop.eup %2909 }
 0x547   : > { %2929 = vrcp.f32 %v1771_v29  ;;  %v1995_v39 = vcombine.low %v1910_v34, %v1911_v35  ;;  %v2912_v24 = vpop.eup %2911  ;;  %v1913_v20 = vmul.f32 %v2910_v38, %v3964_v12 }
 0x548   : > { %v1993_v41 = vrot.slane %v1979_v37, %v3930_v44  ;;  %v2914_v42 = vpop.eup %2913  ;;  %v1772_v43 = vadd.f32 1.0, %v2912_v24  ;;  %v2009_v60 = vrot.slane %v1912_v36, %v3930_v44 }
 0x549   : > { %v2002_v45 = vrot.slane %v1995_v39, %v3930_v44  ;;  %v2916_v46 = vpop.eup %2915  ;;  %v1773_v2 = vadd.f32 1.0, %v2914_v42  ;;  %v2184_v42 = vld [vmem:[#allocation19] sm:$0xff] }
 0x54a   : > { %v1994_v49 = vcombine.low %v1986_v40, %v1993_v41  ;;  %v2918_v26 = vpop.eup %2917  ;;  %v1774_v3 = vadd.f32 1.0, %v2916_v46  ;;  %2931 = vrcp.f32 %v1772_v43  ;;  %v2185_v43 = vld [vmem:[#allocation19 + $0x8] sm:$0xff]  ;;  %v2187_v46 = vld [vmem:[#allocation19 + $0x18] sm:$0xff] }
 0x54b   : > { %v2010_v50 = vcombine.low %v2002_v45, %v2009_v60  ;;  %v2920_v51 = vpop.eup %2919  ;;  %v1775_v1 = vadd.f32 1.0, %v2918_v26  ;;  %2933 = vrcp.f32 %v1773_v2  ;;  %v2186_v45 = vld [vmem:[#allocation19 + $0x10] sm:$0xff]  ;;  %v2671_v60 = vpack.c.bf16 %v2185_v43, %v2184_v42 }
 0x54c   : > { %2090 = vrot.lane.b32.xlu0 %v1994_v49, %s3387_s20  ;;  %v1776_v55 = vadd.f32 1.0, %v2920_v51  ;;  %2935 = vrcp.f32 %v1774_v3  ;;  %v2674_v2 = vpack.c.bf16 %v2187_v46, %v2186_v45  ;;  %v1828_v49 = vpop.permute.xlu1 %1827  ;;  %v1850_v3 = vrot.slane %v3966_v13, %v3930_v44 }
 0x54d   : > { %v2922_v53 = vpop.eup %2921  ;;  %v2017_v57 = vrot.slane %v2010_v50, %v3930_v44  ;;  %2937 = vrcp.f32 %v1775_v1  ;;  %2672 = vmatpush3.bf16.msra.mxu1 %v2671_v60  ;;  %v1839_v50 = vpop.permute.xlu0 %1838 }
 0x54e   : > { %v2924_v61 = vpop.eup %2923  ;;  %2939 = vrcp.f32 %v1776_v55  ;;  %v1915_v63 = vmul.f32 %v2922_v53, %v3986_v27  ;;  %2673 = vmatprep.subr.bf16.mxu1 %v3384_v11 }
 0x54f   : > { %v2926_v58 = vpop.eup %2925  ;;  %2092 = vrot.lane.b32.xlu1 %v2017_v57, %s3387_s20  ;;  %v1916_v4 = vmul.f32 %v2924_v61, %v3990_v28 }
 0x550   : > { %v2928_v62 = vpop.eup %2927  ;;  %v1914_v59 = vmul.f32 %v2926_v58, %v3972_v16  ;;  %v1832_v26 = vpop.permute.xlu1 %1831 }
 0x551   : > { %v2930_v5 = vpop.eup %2929  ;;  %v1777_v6 = vadd.f32 1.0, %v2928_v62  ;;  %v2019_v23 = vcombine.low %v1915_v63, %v1916_v4  ;;  %2675 = vmatpush3.bf16.msra.mxu1 %v2674_v2 }
 0x552   : > { %v1917_v9 = vmul.f32 %v2930_v5, %v3969_v15  ;;  %v2018_v10 = vcombine.low %v1913_v20, %v1914_v59  ;;  %v1851_v20 = vcombine.high %v1850_v3, %v1850_v3 }
 0x553   : > { %2941 = vrcp.f32 %v1777_v6  ;;  %v2035_v16 = vrot.slane %v2019_v23, %v3930_v44 }
 0x554   : > { %v2932_v0 = vpop.eup %2931  ;;  %v2028_v32 = vrot.slane %v2018_v10, %v3930_v44  ;;  %v1843_v51 = vpop.permute.xlu1 %1842  ;;  %v1865_v13 = vrot.slane %v1851_v20, %v3930_v44 }
 0x555   : > { %v2934_v8 = vpop.eup %2933  ;;  %v1918_v25 = vmul.f32 %v2932_v0, %v4008_v47 }
 0x556   : > { %v2936_v29 = vpop.eup %2935  ;;  %v1919_v12 = vmul.f32 %v2934_v8, %v4012_v48  ;;  %v2050_v48 = vcombine.low %v2028_v32, %v2035_v16 }
 0x557   : > { %v2938_v31 = vpop.eup %2937  ;;  %v1920_v27 = vmul.f32 %v2936_v29, %v4017_v22  ;;  %v2020_v28 = vcombine.low %v1917_v9, %v1918_v25  ;;  %v1873_v9 = vrot.slane %v1865_v13, %v3915_v19 }
 0x558   : > { %v2940_v14 = vpop.eup %2939  ;;  %v1921_v15 = vmul.f32 %v2938_v31, %v4020_v52  ;;  %v2058_v24 = vrot.slane %v2050_v48, %v3930_v44  ;;  %v2138_v1 = vpop.permute.xlu1 %2137 }
 0x559   : > { %v1922_v33 = vmul.f32 %v2940_v14, %v4024_v54  ;;  %v2021_v7 = vcombine.low %v1919_v12, %v1920_v27  ;;  %v2042_v34 = vrot.slane %v2020_v28, %v3930_v44  ;;  %v1878_v23 = vmul.f32 %v1873_v9, %v1839_v50 }
 0x55a   : > { %v1879_v25 = vmul.f32 %v1873_v9, %v1843_v51 }
 0x55b   : > { %v2067_v47 = vcombine.low %v1921_v15, %v1922_v33  ;;  %v2049_v35 = vrot.slane %v2021_v7, %v3930_v44 }
 0x55d   : > { %v2942_v36 = vpop.eup %2941  ;;  %v2074_v37 = vrot.slane %v2067_v47, %v3930_v44  ;;  %v2051_v38 = vcombine.low %v2042_v34, %v2049_v35 }
 0x55e   : > { %v1923_v22 = vmul.f32 %v2942_v36, %v4031_v56  ;;  %v2142_v56 = vrot.slane %v4059_v30, %v1835_v21  ;;  %v1858_v21 = vrot.slane %v1850_v3, %v3930_v44  ;;  %v2134_v30 = vpop.permute.xlu0 %2133 }
 0x55f   : > { %v2065_v52 = vrot.slane %v2051_v38, %v3930_v44 }
 0x560   : > { %v2081_v39 = vrot.slane %v1923_v22, %v3930_v44  ;;  %v1869_v53 = vrot.slane %v1858_v21, %v3915_v19 }
 0x561   : > { %v2066_v40 = vcombine.low %v2058_v24, %v2065_v52 }
 0x562   : > { %v2082_v54 = vcombine.low %v2074_v37, %v2081_v39  ;;  %v1876_v57 = vmul.f32 %v1869_v53, %v1828_v49  ;;  %v1877_v58 = vmul.f32 %v1869_v53, %v1832_v26  ;;  %v2273_v26 = vand.u32 127, %v898_v17 }
 0x563   : > { %2094 = vrot.lane.b32.xlu0 %v2066_v40, %s3387_s20 }
 0x564   : > { %v2089_v41 = vrot.slane %v2082_v54, %v3930_v44  ;;  %v2276_v3 = vsub.s32 %v2273_v26, %v3912_v18 }
 0x566   : > { %2096 = vrot.lane.b32.xlu1 %v2089_v41, %s3387_s20  ;;  %v2183_v41 = vld [vmem:[%s523_s17] sm:$0x3] }
 0x567   : > { %2144 = vbcast.lane.b32.xlu0 %v2142_v56, 256 }
 0x56a   : > { %2148 = vbcast.lane.b32.xlu1 %v2142_v56, 264 }
 0x5be   : > { %v2091_v55 = vpop.permute.xlu0 %2090 }
 0x5bf   : > { %v2102_v62 = vadd.f32 %v2091_v55, %v1876_v57 }
 0x5c1   : > { %v2093_v61 = vpop.permute.xlu1 %2092  ;;  %v2150_v63 = vmul.f32 %v2134_v30, %v2102_v62 }
 0x5c2   : > { %v2103_v11 = vadd.f32 %v2093_v61, %v1877_v58 }
 0x5c3   : > { %v2155_v5 = vsel %vm2154_vm10, %v2150_v63, 0.0 }
 0x5c4   : > { %v2151_v4 = vmul.f32 %v2138_v1, %v2103_v11 }
 0x5c6   : > { %v2157_v6 = vsel %vm2156_vm11, %v2151_v4, 0.0 }
 0x5c7   : > { %v2158_v59 = vadd.f32 %v2157_v6, %v2155_v5 }
 0x5c9   : > { %v2159_v8 = vrot.slane %v2158_v59, 4 }
 0x5cb   : > { %v2160_v32 = vadd.f32 %v2159_v8, %v2158_v59 }
 0x5cd   : > { %v2161_v15 = vrot.slane %v2160_v32, 2 }
 0x5cf   : > { %v2162_v34 = vadd.f32 %v2161_v15, %v2160_v32 }
 0x5d1   : > { %v2163_v48 = vrot.slane %v2162_v34, 1 }
 0x5d3   : > { %v2164_v22 = vadd.f32 %v2163_v48, %v2162_v34 }
 0x5d5   : > { %v2095_v10 = vpop.permute.xlu0 %2094 }
 0x5d6   : > { %v2104_v29 = vadd.f32 %v2095_v10, %v1878_v23 }
 0x5d8   : > { %v2097_v0 = vpop.permute.xlu1 %2096 }
 0x5d9   : > { %v2145_v12 = vpop.permute.xlu0 %2144  ;;  %v2105_v31 = vadd.f32 %v2097_v0, %v1879_v25 }
 0x5da   : > { %v2152_v27 = vmul.f32 %v2145_v12, %v2104_v29 }
 0x5dc   : > { %v2149_v28 = vpop.permute.xlu1 %2148  ;;  %v2165_v44 = vsel %vm2154_vm10, %v2152_v27, 0.0 }
 0x5dd   : > { %v2153_v16 = vmul.f32 %v2149_v28, %v2105_v31 }
 0x5df   : > { %v2166_v14 = vsel %vm2156_vm11, %v2153_v16, 0.0 }
 0x5e0   : > { %v2167_v33 = vadd.f32 %v2166_v14, %v2165_v44 }
 0x5e2   : > { %v2168_v7 = vrot.slane %v2167_v33, 4 }
 0x5e4   : > { %v2169_v19 = vadd.f32 %v2168_v7, %v2167_v33 }
 0x5e6   : > { %v2170_v47 = vrot.slane %v2169_v19, 2 }
 0x5e8   : > { %v2171_v35 = vadd.f32 %v2170_v47, %v2169_v19 }
 0x5ea   : > { %v2172_v36 = vrot.slane %v2171_v35, 1 }
 0x5ec   : > { %v2173_v37 = vadd.f32 %v2172_v36, %v2171_v35 }
 0x5ee   : > { %v2177_v38 = vsel %vm2176_vm12, %v2173_v37, %v2164_v22 }
 0x5ef   : > { %2178 = vrot.lane.b32.xlu0 %v2177_v38, %s3389_s24 }
 0x5f3   : > { %2110 = vrot.lane.b32.xlu0 %v2102_v62, %s3389_s24 }
 0x5f7   : > { %2112 = vrot.lane.b32.xlu0 %v2103_v11, %s3389_s24 }
 0x5fb   : > { %2114 = vrot.lane.b32.xlu0 %v2104_v29, %s3389_s24 }
 0x5ff   : > { %2116 = vrot.lane.b32.xlu0 %v2105_v31, %s3389_s24 }
 0x661   : > { %v2179_v39 = vpop.permute.xlu0 %2178 }
 0x662   : > { %2646 = vmatmul.mubr.msk.f32.vlgmr.msra.gmra.mrb[2].mxu1 %vm713_vm9, %v2179_v39  ;;  %2182 = vst.msk [vmem:[#allocation3] sm:$0x3] %vm2181_vm13, %v2179_v39 }
 0x665   : > { %v2111_v24 = vpop.permute.xlu0 %2110 }
 0x666   : > { %2122 = vst.msk [vmem:[#allocation2] sm:$0xff] %vm713_vm9, %v2111_v24 }
 0x669   : > { %v2113_v52 = vpop.permute.xlu0 %2112 }
 0x66a   : > { %2124 = vst.msk [vmem:[#allocation2 + $0x8] sm:$0x7] %vm2123_vm14, %v2113_v52 }
 0x66d   : > { %v2115_v54 = vpop.permute.xlu0 %2114 }
 0x66e   : > { %2125 = vst.msk [vmem:[#allocation2 + $0x10] sm:$0xff] %vm713_vm9, %v2115_v54 }
 0x671   : > { %v2117_v40 = vpop.permute.xlu0 %2116 }
 0x672   : > { %2126 = vst.msk [vmem:[#allocation2 + $0x18] sm:$0x7] %vm2123_vm14, %v2117_v40 }
 0x735   : > { %v2256_v56 = vpop.f32.mrb[2].mxu1 }
 0x736   : > { %v2260_v42 = vadd.f32 %v2256_v56, %v2183_v41  ;;  %v2647_v43 = vpop.f32.mrb[3].mxu1 }
 0x738   : > { %v2561_v45 = vmul.f32 -1.442695, %v2260_v42 }
 0x73a   : > { %2943 = vpow2.f32 %v2561_v45 }
 0x744   : > { %v2944_v60 = vpop.eup %2943 }
 0x745   : > { %v2264_v46 = vadd.f32 1.0, %v2944_v60 }
 0x747   : > { %2945 = vrcp.f32 %v2264_v46 }
 0x751   : > { %v2946_v2 = vpop.eup %2945 }
 0x752   : > { %v2267_v49 = vsel %vm2181_vm13, %v2946_v2, 0.0 }
 0x753   : > { %2268 = vadd.xlane.f32.xlu1 %v2267_v49 }
 0x7e0   : > { %v2269_v50 = vpop.xlane.xlu1 %2268 }
 0x7e1   : > { %v2270_v51 = vmul.f32 0.03125, %v2269_v50 }
 0x7e3   : > { %v2277_v21 = vrot.slane %v2270_v51, %v2276_v3 }
 0x7e5   : > { %2281 = vst.msk [vmem:[%s2279_s14] sm:$0x1] %vm2280_vm15, %v2277_v21 }
 0x7e6   : > { %3251 = shalt.err (!%p3248_p2)
}
 0x7e7   : > { %s4359_s30 = sld [smem:[#allocation46_spill]] }
 0x7ed   : > { %s3252_s5 = scalar_lea.hbm %s4359_s30, 128 }
 0x7ee   : > { %p3253_p1 = scmp.ne.s32.totalorder %s4359_s30, %s3252_s5  ;;  %p3258_p7 = scmp.lt.u32.totalorder %s3252_s5, %s4359_s30 }
 0x7f0   : > { %p3254_p3 = pnand %p3253_p1, %p2753_p8 }
 0x7f2   : > { %p3255_p5 = pneg %p3254_p3 }
 0x7f4   : > { %p3260_p11 = pnand %p3258_p7, %p3255_p5 }
 0x7f6   : > { %3263 = shalt.err (!%p3260_p11)
}
 0x7f7   : > { %2707 = dma.vmem_to_hbm [thread:$0]  (%p2753_p8), %s2292_s11, 128, %s4359_s30, [#allocation6]  }
 0x7f8   : > { %3329 = dma.done.wait (%p2753_p8), [#allocation6], 128  }
 0x7f9   : > { %3331 = vsyncadd (%p2753_p8), [#allocation6], 4294967168 }
 0x7fa PF: > { %s33_s21 = sadd.s32 1, %s3366_s21   ;;  %s4360_s13 = sld [smem:[#allocation31_spill]] }
 0x7fb   : > { %p30_p0 = scmp.ge.s32.totalorder %s33_s21, 9   ;;  %s4361_s16 = sld [smem:[#allocation32_spill]] }
 0x7fc   : > { %s4362_s23 = sld [smem:[#allocation39_spill]]  ;;  %s4363_s19 = sld [smem:[#allocation34_spill]] }
 0x7fd   : > { %s4364_s20 = sld [smem:[#allocation37_spill]]  ;;  %s4365_s14 = smov %s3342_s15 }
 0x7fe   : > { %s4366_s15 = smov %s3811_s3  ;;  %s4367_s17 = smov %s3354_s18 }
 0x7ff   :  { %32 = sbr.rel (!%p30_p0) target bundleno = 21 (0x15), region = 171 }
 0x802   : > { %s4368_s18 = smov %s4362_s23 }
 0x806   :  { %2304 = vsyncpa [#allocation5], 1 }
 0x807   :  { %2306 = vsyncpa [#allocation5 + $0x1], 1 }
 0x808   :  { %2307 = vsyncpa [#allocation8], 1 }
 0x809   :  { %2309 = vsyncpa [#allocation8 + $0x1], 1 }
 0x80a   :  { %2310 = vsyncpa [#allocation11], 1 }
 0x80b   :  { %2312 = vsyncpa [#allocation11 + $0x1], 1 }
 0x80c   :  { %2313 = vsyncpa [#allocation14], 1 }
 0x80d   :  { %2314 = vsyncpa [#allocation17], 1 }
 0x80e   :  { %2315 = vsyncpa [#allocation20], 1 }
 0x80f   :  { %2316 = vsyncpa [#allocation6], 1 }
 0x810   :  { %2318 = vsyncpa [#allocation6 + $0x1], 1 }

</bundles_post_ra>
